<compile_context>
chip_gen: v7x
topology: tpu7x:2x2x1
jax: 0.10.0
libtpu: 0.0.40
codegen_flags: <defaults>
</compile_context>

<pallas_src>
import math
from functools import partial

import jax
import jax.numpy as jnp
from jax import lax
from jax.experimental import pallas as pl
from jax.experimental.pallas import tpu as pltpu


# ------------------------------ helpers ------------------------------------ #
def _layernorm(v, g, b, eps):
    mu = jnp.mean(v, axis=-1, keepdims=True)
    var = jnp.mean((v - mu) * (v - mu), axis=-1, keepdims=True)
    return (v - mu) * lax.rsqrt(var + eps) * g + b


def _vmem_capacity_bytes():
    try:
        return int(pltpu.get_tpu_info().vmem_capacity_bytes)
    except Exception:
        return 128 * 1024 * 1024


def _pick_tile(total, pref):
    """Largest power-of-two-ish divisor of `total` that is <= pref (multiple of 8), else total."""
    if total <= pref:
        return total
    t = pref
    while t >= 8:
        if total % t == 0:
            return t
        t //= 2
    return total


# ------------------------ K/V precompute kernel ----------------------------- #
def gpt2_kv_kernel(x_ref, ln1g_ref, ln1b_ref, wk_ref, bk_ref, wv_ref, bv_ref,
                   k_ref, v_ref, *, eps):
    xn = _layernorm(x_ref[0], ln1g_ref[...], ln1b_ref[...], eps).astype(jnp.bfloat16)
    k = jnp.dot(xn, wk_ref[...], preferred_element_type=jnp.float32) + bk_ref[...]
    v = jnp.dot(xn, wv_ref[...], preferred_element_type=jnp.float32) + bv_ref[...]
    k_ref[0] = k.astype(k_ref.dtype)
    v_ref[0] = v.astype(v_ref.dtype)


# ------------------------------ main kernel --------------------------------- #
def gpt2_layer_kernel(
    # inputs
    x_ref, mask_ref, k_ref, v_ref,
    ln1g_ref, ln1b_ref, wq_ref, bq_ref,
    wad_ref, bad_ref, ln2g_ref, ln2b_ref,
    wi_ref, bi_ref, wo_ref, bo_ref,
    # output
    o_ref,
    # scratch
    ctx_ref,
    *, num_heads, head_dim, head_chunk, seq_len, q_tile, eps,
):
    bf16 = jnp.bfloat16
    qi = pl.program_id(1)
    q_start = pl.multiple_of(qi * q_tile, q_tile)

    x_tile = x_ref[0]                                       # [tq, H] f32
    add_mask = mask_ref[...].reshape(1, seq_len)            # [1, S]  additive pad mask

    # ---- LN1 on this q-tile only (full-seq LN1 + K/V are hoisted to gpt2_kv_kernel) ----
    xn = _layernorm(x_tile, ln1g_ref[...], ln1b_ref[...], eps).astype(bf16)

    # ---- Q projection (1/sqrt(head_dim) already folded into Wq/bq in the wrapper) ----
    q = (jnp.dot(xn, wq_ref[...], preferred_element_type=jnp.float32)
         + bq_ref[...]).astype(bf16)                         # [tq, H]

    k_full = k_ref[0]                                        # [S, H] bf16 (precomputed)
    v_full = v_ref[0]                                        # [S, H] bf16

    # one additive bias per grid step: causal + padding folded together
    row = lax.broadcasted_iota(jnp.int32, (q_tile, seq_len), 0) + q_start
    col = lax.broadcasted_iota(jnp.int32, (q_tile, seq_len), 1)
    bias = jnp.where(col <= row, add_mask, jnp.float32(-1e9))          # [tq, S]

    # ---- head-chunked causal attention (peak intermediates: [chunk, tq, S] not [nh, tq, S]) ----
    for c in range(num_heads // head_chunk):
        c0 = c * head_chunk * head_dim
        c1 = c0 + head_chunk * head_dim
        q_c = q[:, c0:c1].reshape(q_tile, head_chunk, head_dim)
        k_c = k_full[:, c0:c1].reshape(seq_len, head_chunk, head_dim)
        v_c = v_full[:, c0:c1].reshape(seq_len, head_chunk, head_dim)

        s = jnp.einsum("qhd,khd->hqk", q_c, k_c,
                       preferred_element_type=jnp.float32)              # [hc, tq, S]
        s = s + bias[None, :, :]
        s = s - jnp.max(s, axis=-1, keepdims=True)
        p = jnp.exp(s)
        p = p * pl.reciprocal(jnp.sum(p, axis=-1, keepdims=True), approx=True)

        ctx_c = jnp.einsum("hqk,khd->qhd", p.astype(bf16), v_c,
                           preferred_element_type=jnp.float32)          # [tq, hc, hd]
        ctx_ref[:, c0:c1] = ctx_c.reshape(q_tile, head_chunk * head_dim).astype(bf16)

    # ---- attention output dense + residual (dropout = identity in eval) ----
    attn_proj = jnp.dot(ctx_ref[...], wad_ref[...],
                        preferred_element_type=jnp.float32) + bad_ref[...]
    h1 = x_tile + attn_proj

    # ---- LN2 + MLP (exact erf GELU, f32) + residual ----
    xn2 = _layernorm(h1, ln2g_ref[...], ln2b_ref[...], eps)
    ff = jnp.dot(xn2.astype(bf16), wi_ref[...],
                 preferred_element_type=jnp.float32) + bi_ref[...]
    ff = jax.nn.gelu(ff, approximate=False)                  # matches torch F.gelu default
    out = jnp.dot(ff.astype(bf16), wo_ref[...],
                  preferred_element_type=jnp.float32) + bo_ref[...]

    o_ref[0] = (h1 + out).astype(o_ref.dtype)
    # TODO(synk): dropout (attention_dropout / out_dropout) omitted — eval semantics (identity).


# ------------------------------ wrapper ------------------------------------ #
def _gpt2_layer(x, attn_mask_add, params, *, num_heads, eps, q_tile, head_chunk, fast_specs):
    B, S, H = x.shape
    I = params["wi"].shape[1]
    head_dim = H // num_heads
    assert num_heads * head_dim == H

    # --- per-generation tiling / VMEM budget ---
    vmem_cap = _vmem_capacity_bytes()
    small_vmem = vmem_cap <= 64 * 1024 * 1024                 # v7x-class parts
    if q_tile is None:
        q_tile = _pick_tile(S, 256 if small_vmem else 512)
    assert S % q_tile == 0 and (q_tile == S or q_tile % 8 == 0)
    n_qt = S // q_tile
    kv_tile = _pick_tile(S, 512)
    n_kvt = S // kv_tile
    vmem_limit = (56 if small_vmem else 100) * 1024 * 1024

    if head_chunk is None:
        head_chunk = 1
        for c in range(1, min(num_heads, 4) + 1):
            if num_heads % c == 0:
                head_chunk = c
    assert num_heads % head_chunk == 0

    bf16 = jnp.bfloat16
    scale = 1.0 / math.sqrt(head_dim)
    wq = (params["wq"] * scale).astype(bf16)                  # fold 1/sqrt(hd) into Q proj
    bq = params["bq"] * scale
    wk, wv = params["wk"].astype(bf16), params["wv"].astype(bf16)
    wad = params["wad"].astype(bf16)
    wi, wo = params["wi"].astype(bf16), params["wo"].astype(bf16)

    def const_spec(shape):
        idx = lambda b, t: (0,) * len(shape)
        if fast_specs:
            # block index never changes -> single buffer (halves resident weight VMEM)
            return pl.BlockSpec(shape, idx, pipeline_mode=pl.Buffered(1))
        return pl.BlockSpec(shape, idx)

    cparams = pltpu.CompilerParams(
        dimension_semantics=("parallel", "parallel"),
        vmem_limit_bytes=vmem_limit,
    )

    # --- 1) K/V precompute: LN1 + K/V projections, computed once per token (not per q-tile) ---
    kv_kwargs = {}
    if fast_specs:
        kv_kwargs["cost_estimate"] = pl.CostEstimate(
            flops=int(4 * B * S * H * H),
            transcendentals=int(B * S),
            bytes_accessed=int(4 * B * S * H + 4 * B * S * H + 4 * H * H),
        )
    k_bf, v_bf = pl.pallas_call(
        partial(gpt2_kv_kernel, eps=eps),
        out_shape=(jax.ShapeDtypeStruct((B, S, H), bf16),
                   jax.ShapeDtypeStruct((B, S, H), bf16)),
        grid_spec=pltpu.PrefetchScalarGridSpec(
            num_scalar_prefetch=0,
            grid=(B, n_kvt),
            in_specs=[
                pl.BlockSpec((1, kv_tile, H), lambda b, t: (b, t, 0)),   # x tile
                const_spec((1, H)), const_spec((1, H)),                  # ln1 gamma/beta
                const_spec((H, H)), const_spec((1, H)),                  # Wk, bk
                const_spec((H, H)), const_spec((1, H)),                  # Wv, bv
            ],
            out_specs=(pl.BlockSpec((1, kv_tile, H), lambda b, t: (b, t, 0)),
                       pl.BlockSpec((1, kv_tile, H), lambda b, t: (b, t, 0))),
        ),
        compiler_params=cparams,
        **kv_kwargs,
    )(x, params["ln1_g"], params["ln1_b"], wk, params["bk"], wv, params["bv"])

    # --- 2) main fused layer: Q proj, attention, dense, LN2, MLP, residuals ---
    main_kwargs = {}
    if fast_specs:
        main_kwargs["cost_estimate"] = pl.CostEstimate(
            flops=int(2 * B * S * (2 * H * H + 2 * S * H + 2 * H * I)),
            transcendentals=int(B * num_heads * S * S + B * S * I),
            bytes_accessed=int(8 * B * S * H + 4 * B * S * H + 2 * (2 * H * H + 2 * H * I)),
        )

    kernel = partial(
        gpt2_layer_kernel,
        num_heads=num_heads, head_dim=head_dim, head_chunk=head_chunk,
        seq_len=S, q_tile=q_tile, eps=eps,
    )

    return pl.pallas_call(
        kernel,
        out_shape=jax.ShapeDtypeStruct((B, S, H), x.dtype),
        grid_spec=pltpu.PrefetchScalarGridSpec(
            num_scalar_prefetch=0,
            grid=(B, n_qt),
            in_specs=[
                pl.BlockSpec((1, q_tile, H), lambda b, t: (b, t, 0)),     # x (tiled, not full seq)
                pl.BlockSpec((1, 1, 1, S), lambda b, t: (b, 0, 0, 0)),    # additive pad mask
                pl.BlockSpec((1, S, H), lambda b, t: (b, 0, 0)),          # K (bf16, precomputed)
                pl.BlockSpec((1, S, H), lambda b, t: (b, 0, 0)),          # V (bf16, precomputed)
                const_spec((1, H)), const_spec((1, H)),                   # ln1 gamma/beta
                const_spec((H, H)), const_spec((1, H)),                   # Wq, bq (scale folded)
                const_spec((H, H)), const_spec((1, H)),                   # attention_dense
                const_spec((1, H)), const_spec((1, H)),                   # ln2 gamma/beta
                const_spec((H, I)), const_spec((1, I)),                   # interm_dense
                const_spec((I, H)), const_spec((1, H)),                   # out_dense
            ],
            out_specs=pl.BlockSpec((1, q_tile, H), lambda b, t: (b, t, 0)),
            scratch_shapes=[pltpu.VMEM((q_tile, H), bf16)],               # ctx accumulator
        ),
        compiler_params=cparams,
        **main_kwargs,
    )(
        x, attn_mask_add, k_bf, v_bf,
        params["ln1_g"], params["ln1_b"], wq, bq,
        wad, params["bad"],
        params["ln2_g"], params["ln2_b"],
        wi, params["bi"], wo, params["bo"],
    )


def gpt2_layer(x, attn_mask_add, params, *, num_heads, eps=1e-5, q_tile=None, head_chunk=None):
    try:
        return _gpt2_layer(x, attn_mask_add, params, num_heads=num_heads, eps=eps,
                           q_tile=q_tile, head_chunk=head_chunk, fast_specs=True)
    except Exception:
        # Conservative fallback (no pl.Buffered(1) / cost_estimate) so the kernel always runs.
        return _gpt2_layer(x, attn_mask_add, params, num_heads=num_heads, eps=eps,
                           q_tile=q_tile, head_chunk=head_chunk, fast_specs=False)


# ------------------------- pure-JAX reference (f32) ------------------------ #
def gpt2_layer_ref(x, attn_mask_add, params, *, num_heads, eps=1e-5):
    B, S, H = x.shape
    hd = H // num_heads

    def ln(v, g, b):
        mu = v.mean(-1, keepdims=True)
        var = ((v - mu) ** 2).mean(-1, keepdims=True)
        return (v - mu) / jnp.sqrt(var + eps) * g + b

    xn = ln(x, params["ln1_g"], params["ln1_b"])
    q = xn @ params["wq"] + params["bq"]
    k = xn @ params["wk"] + params["bk"]
    v = xn @ params["wv"] + params["bv"]

    def split(t):  # [B,S,H] -> [B,nh,S,hd]
        return t.reshape(B, S, num_heads, hd).transpose(0, 2, 1, 3)

    qh, kh, vh = split(q), split(k), split(v)
    s = jnp.einsum("bhqd,bhkd->bhqk", qh, kh) / math.sqrt(hd)
    causal = jnp.tril(jnp.ones((S, S), bool))
    s = jnp.where(causal[None, None], s, -1e9) + attn_mask_add
    p = jax.nn.softmax(s, axis=-1)
    ctx = jnp.einsum("bhqk,bhkd->bhqd", p, vh).transpose(0, 2, 1, 3).reshape(B, S, H)

    h1 = x + (ctx @ params["wad"] + params["bad"])
    xn2 = ln(h1, params["ln2_g"], params["ln2_b"])
    ff = jax.nn.gelu(xn2 @ params["wi"] + params["bi"], approximate=False)
    return h1 + (ff @ params["wo"] + params["bo"])


# --------------------------------- main ------------------------------------ #
if __name__ == "__main__":
    B, S, H = 2, 8, 32
    NUM_HEADS = 2
    I = 4 * H
    EPS = 1e-5

    key = jax.random.PRNGKey(0)
    ks = jax.random.split(key, 16)

    def w(k, shape, scale=0.02):
        return (scale * jax.random.normal(k, shape)).astype(jnp.float32)

    params = {
        "ln1_g": jnp.ones((1, H), jnp.float32),
        "ln1_b": jnp.zeros((1, H), jnp.float32),
        "wq": w(ks[0], (H, H)), "bq": w(ks[1], (1, H)),
        "wk": w(ks[2], (H, H)), "bk": w(ks[3], (1, H)),
        "wv": w(ks[4], (H, H)), "bv": w(ks[5], (1, H)),
        "wad": w(ks[6], (H, H)), "bad": w(ks[7], (1, H)),
        "ln2_g": jnp.ones((1, H), jnp.float32),
        "ln2_b": jnp.zeros((1, H), jnp.float32),
        "wi": w(ks[8], (H, I)), "bi": w(ks[9], (1, I)),
        "wo": w(ks[10], (I, H)), "bo": w(ks[11], (1, H)),
    }

    x = jax.random.normal(ks[12], (B, S, H), jnp.float32)

    # Padding mask: second example has its last 2 positions padded.
    keep = jnp.ones((B, S), jnp.float32).at[1, -2:].set(0.0)
    attn_mask_add = ((1.0 - keep) * -10000.0)[:, None, None, :]   # [B,1,1,S]

    out = gpt2_layer(x, attn_mask_add, params, num_heads=NUM_HEADS, eps=EPS)
    out = jax.block_until_ready(out)

    ref = gpt2_layer_ref(x, attn_mask_add, params, num_heads=NUM_HEADS, eps=EPS)
    assert out.shape == (B, S, H)
    max_err = float(jnp.abs(out - ref).max())
    # bf16 matmul inputs (f32 accumulation) + approx reciprocal => relaxed tolerance vs f32 ref.
    assert jnp.allclose(out, ref, atol=2e-2, rtol=2e-2), max_err

    print("KERNEL_OK")
</pallas_src>

<mosaic_0001>
module attributes {stable_mosaic.version = 11 : i64} {
  func.func @gpt2_kv_kernel(%arg0: i32, %arg1: i32, %arg2: memref<1x8x32xf32, #tpu.memory_space<vmem>>, %arg3: memref<1x32xf32, #tpu.memory_space<vmem>>, %arg4: memref<1x32xf32, #tpu.memory_space<vmem>>, %arg5: memref<32x32xbf16, #tpu.memory_space<vmem>>, %arg6: memref<1x32xf32, #tpu.memory_space<vmem>>, %arg7: memref<32x32xbf16, #tpu.memory_space<vmem>>, %arg8: memref<1x32xf32, #tpu.memory_space<vmem>>, %arg9: memref<1x8x32xbf16, #tpu.memory_space<vmem>>, %arg10: memref<1x8x32xbf16, #tpu.memory_space<vmem>>) attributes {dimension_semantics = [#tpu.dimension_semantics<parallel>, #tpu.dimension_semantics<parallel>], iteration_bounds = array<i64: 2, 1>, scalar_prefetch = 0 : i64, scratch_operands = 0 : i64, tpu.core_type = #tpu.core_type<tc>, window_params = [{transform_indices = @transform_0, window_bounds = array<i64: 1, 8, 32>}, {pipeline_mode = #tpu.pipeline_mode<synchronous>, transform_indices = @transform_1, window_bounds = array<i64: 1, 32>}, {pipeline_mode = #tpu.pipeline_mode<synchronous>, transform_indices = @transform_2, window_bounds = array<i64: 1, 32>}, {pipeline_mode = #tpu.pipeline_mode<synchronous>, transform_indices = @transform_3, window_bounds = array<i64: 32, 32>}, {pipeline_mode = #tpu.pipeline_mode<synchronous>, transform_indices = @transform_4, window_bounds = array<i64: 1, 32>}, {pipeline_mode = #tpu.pipeline_mode<synchronous>, transform_indices = @transform_5, window_bounds = array<i64: 32, 32>}, {pipeline_mode = #tpu.pipeline_mode<synchronous>, transform_indices = @transform_6, window_bounds = array<i64: 1, 32>}, {transform_indices = @transform_7, window_bounds = array<i64: 1, 8, 32>}, {transform_indices = @transform_8, window_bounds = array<i64: 1, 8, 32>}]} {
    %c0 = arith.constant 0 : index
    %c0_0 = arith.constant 0 : index
    %c0_1 = arith.constant 0 : index
    %0 = vector.load %arg2[%c0, %c0_0, %c0_1] : memref<1x8x32xf32, #tpu.memory_space<vmem>>, vector<1x8x32xf32>
    %1 = vector.shape_cast %0 : vector<1x8x32xf32> to vector<8x32xf32>
    %c0_2 = arith.constant 0 : index
    %c0_3 = arith.constant 0 : index
    %2 = vector.load %arg3[%c0_2, %c0_3] : memref<1x32xf32, #tpu.memory_space<vmem>>, vector<1x32xf32>
    %c0_4 = arith.constant 0 : index
    %c0_5 = arith.constant 0 : index
    %3 = vector.load %arg4[%c0_4, %c0_5] : memref<1x32xf32, #tpu.memory_space<vmem>>, vector<1x32xf32>
    %cst = arith.constant dense<0.000000e+00> : vector<8xf32>
    %4 = vector.multi_reduction <add>, %1, %cst [1] : vector<8x32xf32> to vector<8xf32>
    %5 = vector.shape_cast %4 : vector<8xf32> to vector<8x1xf32>
    %cst_6 = arith.constant 3.200000e+01 : f32
    %6 = vector.broadcast %cst_6 : f32 to vector<8x1xf32>
    %7 = arith.divf %5, %6 : vector<8x1xf32>
    %8 = vector.broadcast %7 : vector<8x1xf32> to vector<8x32xf32>
    %9 = arith.subf %1, %8 : vector<8x32xf32>
    %10 = vector.broadcast %7 : vector<8x1xf32> to vector<8x32xf32>
    %11 = arith.subf %1, %10 : vector<8x32xf32>
    %12 = arith.mulf %9, %11 : vector<8x32xf32>
    %cst_7 = arith.constant dense<0.000000e+00> : vector<8xf32>
    %13 = vector.multi_reduction <add>, %12, %cst_7 [1] : vector<8x32xf32> to vector<8xf32>
    %14 = vector.shape_cast %13 : vector<8xf32> to vector<8x1xf32>
    %cst_8 = arith.constant 3.200000e+01 : f32
    %15 = vector.broadcast %cst_8 : f32 to vector<8x1xf32>
    %16 = arith.divf %14, %15 : vector<8x1xf32>
    %17 = vector.broadcast %7 : vector<8x1xf32> to vector<8x32xf32>
    %18 = arith.subf %1, %17 : vector<8x32xf32>
    %cst_9 = arith.constant 9.99999974E-6 : f32
    %19 = vector.broadcast %cst_9 : f32 to vector<8x1xf32>
    %20 = arith.addf %16, %19 : vector<8x1xf32>
    %21 = math.rsqrt %20 : vector<8x1xf32>
    %22 = vector.broadcast %21 : vector<8x1xf32> to vector<8x32xf32>
    %23 = arith.mulf %18, %22 : vector<8x32xf32>
    %24 = vector.broadcast %2 : vector<1x32xf32> to vector<8x32xf32>
    %25 = arith.mulf %23, %24 : vector<8x32xf32>
    %26 = vector.broadcast %3 : vector<1x32xf32> to vector<8x32xf32>
    %27 = arith.addf %25, %26 : vector<8x32xf32>
    %28 = arith.truncf %27 : vector<8x32xf32> to vector<8x32xbf16>
    %c0_10 = arith.constant 0 : index
    %c0_11 = arith.constant 0 : index
    %29 = vector.load %arg5[%c0_10, %c0_11] : memref<32x32xbf16, #tpu.memory_space<vmem>>, vector<32x32xbf16>
    %cst_12 = arith.constant dense<0.000000e+00> : vector<8x32xf32>
    %30 = tpu.matmul %28, %29, %cst_12 {dimension_numbers = #tpu.dot_dimension_numbers<[1], [0], [0], [1], [0, 0, 1, 1], [], []>} : vector<8x32xbf16>, vector<32x32xbf16>, vector<8x32xf32> -> vector<8x32xf32>
    %c0_13 = arith.constant 0 : index
    %c0_14 = arith.constant 0 : index
    %31 = vector.load %arg6[%c0_13, %c0_14] : memref<1x32xf32, #tpu.memory_space<vmem>>, vector<1x32xf32>
    %32 = vector.broadcast %31 : vector<1x32xf32> to vector<8x32xf32>
    %33 = arith.addf %30, %32 : vector<8x32xf32>
    %c0_15 = arith.constant 0 : index
    %c0_16 = arith.constant 0 : index
    %34 = vector.load %arg7[%c0_15, %c0_16] : memref<32x32xbf16, #tpu.memory_space<vmem>>, vector<32x32xbf16>
    %cst_17 = arith.constant dense<0.000000e+00> : vector<8x32xf32>
    %35 = tpu.matmul %28, %34, %cst_17 {dimension_numbers = #tpu.dot_dimension_numbers<[1], [0], [0], [1], [0, 0, 1, 1], [], []>} : vector<8x32xbf16>, vector<32x32xbf16>, vector<8x32xf32> -> vector<8x32xf32>
    %c0_18 = arith.constant 0 : index
    %c0_19 = arith.constant 0 : index
    %36 = vector.load %arg8[%c0_18, %c0_19] : memref<1x32xf32, #tpu.memory_space<vmem>>, vector<1x32xf32>
    %37 = vector.broadcast %36 : vector<1x32xf32> to vector<8x32xf32>
    %38 = arith.addf %35, %37 : vector<8x32xf32>
    %39 = arith.truncf %33 : vector<8x32xf32> to vector<8x32xbf16>
    %c0_20 = arith.constant 0 : index
    %c0_21 = arith.constant 0 : index
    %c0_22 = arith.constant 0 : index
    %40 = vector.load %arg9[%c0_20, %c0_21, %c0_22] : memref<1x8x32xbf16, #tpu.memory_space<vmem>>, vector<1x8x32xbf16>
    %41 = vector.shape_cast %40 : vector<1x8x32xbf16> to vector<8x32xbf16>
    %42 = vector.shape_cast %39 : vector<8x32xbf16> to vector<1x8x32xbf16>
    tpu.vector_store %arg9[%c0_20, %c0_21, %c0_22], %42 {strides = array<i32>} : memref<1x8x32xbf16, #tpu.memory_space<vmem>>, vector<1x8x32xbf16>,
    %43 = arith.truncf %38 : vector<8x32xf32> to vector<8x32xbf16>
    %c0_23 = arith.constant 0 : index
    %c0_24 = arith.constant 0 : index
    %c0_25 = arith.constant 0 : index
    %44 = vector.load %arg10[%c0_23, %c0_24, %c0_25] : memref<1x8x32xbf16, #tpu.memory_space<vmem>>, vector<1x8x32xbf16>
    %45 = vector.shape_cast %44 : vector<1x8x32xbf16> to vector<8x32xbf16>
    %46 = vector.shape_cast %43 : vector<8x32xbf16> to vector<1x8x32xbf16>
    tpu.vector_store %arg10[%c0_23, %c0_24, %c0_25], %46 {strides = array<i32>} : memref<1x8x32xbf16, #tpu.memory_space<vmem>>, vector<1x8x32xbf16>,
    return
  }
  func.func @transform_0(%arg0: i32, %arg1: i32) -> (i32, i32, i32) {
    %c0_i32 = arith.constant 0 : i32
    %c0_i32_0 = arith.constant 0 : i32
    return %arg0, %arg1, %c0_i32 : i32, i32, i32
  }
  func.func @transform_1(%arg0: i32, %arg1: i32) -> (i32, i32) {
    %c0_i32 = arith.constant 0 : i32
    %c0_i32_0 = arith.constant 0 : i32
    %c0_i32_1 = arith.constant 0 : i32
    return %c0_i32, %c0_i32_0 : i32, i32
  }
  func.func @transform_2(%arg0: i32, %arg1: i32) -> (i32, i32) {
    %c0_i32 = arith.constant 0 : i32
    %c0_i32_0 = arith.constant 0 : i32
    %c0_i32_1 = arith.constant 0 : i32
    return %c0_i32, %c0_i32_0 : i32, i32
  }
  func.func @transform_3(%arg0: i32, %arg1: i32) -> (i32, i32) {
    %c0_i32 = arith.constant 0 : i32
    %c0_i32_0 = arith.constant 0 : i32
    %c0_i32_1 = arith.constant 0 : i32
    return %c0_i32, %c0_i32_0 : i32, i32
  }
  func.func @transform_4(%arg0: i32, %arg1: i32) -> (i32, i32) {
    %c0_i32 = arith.constant 0 : i32
    %c0_i32_0 = arith.constant 0 : i32
    %c0_i32_1 = arith.constant 0 : i32
    return %c0_i32, %c0_i32_0 : i32, i32
  }
  func.func @transform_5(%arg0: i32, %arg1: i32) -> (i32, i32) {
    %c0_i32 = arith.constant 0 : i32
    %c0_i32_0 = arith.constant 0 : i32
    %c0_i32_1 = arith.constant 0 : i32
    return %c0_i32, %c0_i32_0 : i32, i32
  }
  func.func @transform_6(%arg0: i32, %arg1: i32) -> (i32, i32) {
    %c0_i32 = arith.constant 0 : i32
    %c0_i32_0 = arith.constant 0 : i32
    %c0_i32_1 = arith.constant 0 : i32
    return %c0_i32, %c0_i32_0 : i32, i32
  }
  func.func @transform_7(%arg0: i32, %arg1: i32) -> (i32, i32, i32) {
    %c0_i32 = arith.constant 0 : i32
    %c0_i32_0 = arith.constant 0 : i32
    return %arg0, %arg1, %c0_i32 : i32, i32, i32
  }
  func.func @transform_8(%arg0: i32, %arg1: i32) -> (i32, i32, i32) {
    %c0_i32 = arith.constant 0 : i32
    %c0_i32_0 = arith.constant 0 : i32
    return %arg0, %arg1, %c0_i32 : i32, i32, i32
  }
}

module attributes {stable_mosaic.version = 11 : i64} {
  func.func @gpt2_kv_kernel(%arg0: i32, %arg1: i32, %arg2: memref<1x8x32xf32, #tpu.memory_space<vmem>>, %arg3: memref<1x32xf32, #tpu.memory_space<vmem>>, %arg4: memref<1x32xf32, #tpu.memory_space<vmem>>, %arg5: memref<32x32xbf16, #tpu.memory_space<vmem>>, %arg6: memref<1x32xf32, #tpu.memory_space<vmem>>, %arg7: memref<32x32xbf16, #tpu.memory_space<vmem>>, %arg8: memref<1x32xf32, #tpu.memory_space<vmem>>, %arg9: memref<1x8x32xbf16, #tpu.memory_space<vmem>>, %arg10: memref<1x8x32xbf16, #tpu.memory_space<vmem>>) attributes {dimension_semantics = [#tpu.dimension_semantics<parallel>, #tpu.dimension_semantics<parallel>], iteration_bounds = array<i64: 2, 1>, scalar_prefetch = 0 : i64, scratch_operands = 0 : i64, tpu.core_type = #tpu.core_type<tc>, window_params = [{transform_indices = @transform_0, window_bounds = array<i64: 1, 8, 32>}, {pipeline_mode = #tpu.pipeline_mode<synchronous>, transform_indices = @transform_1, window_bounds = array<i64: 1, 32>}, {pipeline_mode = #tpu.pipeline_mode<synchronous>, transform_indices = @transform_2, window_bounds = array<i64: 1, 32>}, {pipeline_mode = #tpu.pipeline_mode<synchronous>, transform_indices = @transform_3, window_bounds = array<i64: 32, 32>}, {pipeline_mode = #tpu.pipeline_mode<synchronous>, transform_indices = @transform_4, window_bounds = array<i64: 1, 32>}, {pipeline_mode = #tpu.pipeline_mode<synchronous>, transform_indices = @transform_5, window_bounds = array<i64: 32, 32>}, {pipeline_mode = #tpu.pipeline_mode<synchronous>, transform_indices = @transform_6, window_bounds = array<i64: 1, 32>}, {transform_indices = @transform_7, window_bounds = array<i64: 1, 8, 32>}, {transform_indices = @transform_8, window_bounds = array<i64: 1, 8, 32>}]} {
    %c0 = arith.constant 0 : index
    %c0_0 = arith.constant 0 : index
    %c0_1 = arith.constant 0 : index
    %0 = vector.load %arg2[%c0, %c0_0, %c0_1] : memref<1x8x32xf32, #tpu.memory_space<vmem>>, vector<1x8x32xf32>
    %1 = vector.shape_cast %0 : vector<1x8x32xf32> to vector<8x32xf32>
    %c0_2 = arith.constant 0 : index
    %c0_3 = arith.constant 0 : index
    %2 = vector.load %arg3[%c0_2, %c0_3] : memref<1x32xf32, #tpu.memory_space<vmem>>, vector<1x32xf32>
    %c0_4 = arith.constant 0 : index
    %c0_5 = arith.constant 0 : index
    %3 = vector.load %arg4[%c0_4, %c0_5] : memref<1x32xf32, #tpu.memory_space<vmem>>, vector<1x32xf32>
    %cst = arith.constant dense<0.000000e+00> : vector<8xf32>
    %4 = vector.multi_reduction <add>, %1, %cst [1] : vector<8x32xf32> to vector<8xf32>
    %5 = vector.shape_cast %4 : vector<8xf32> to vector<8x1xf32>
    %cst_6 = arith.constant 3.200000e+01 : f32
    %6 = vector.broadcast %cst_6 : f32 to vector<8x1xf32>
    %7 = arith.divf %5, %6 : vector<8x1xf32>
    %8 = vector.broadcast %7 : vector<8x1xf32> to vector<8x32xf32>
    %9 = arith.subf %1, %8 : vector<8x32xf32>
    %10 = vector.broadcast %7 : vector<8x1xf32> to vector<8x32xf32>
    %11 = arith.subf %1, %10 : vector<8x32xf32>
    %12 = arith.mulf %9, %11 : vector<8x32xf32>
    %cst_7 = arith.constant dense<0.000000e+00> : vector<8xf32>
    %13 = vector.multi_reduction <add>, %12, %cst_7 [1] : vector<8x32xf32> to vector<8xf32>
    %14 = vector.shape_cast %13 : vector<8xf32> to vector<8x1xf32>
    %cst_8 = arith.constant 3.200000e+01 : f32
    %15 = vector.broadcast %cst_8 : f32 to vector<8x1xf32>
    %16 = arith.divf %14, %15 : vector<8x1xf32>
    %17 = vector.broadcast %7 : vector<8x1xf32> to vector<8x32xf32>
    %18 = arith.subf %1, %17 : vector<8x32xf32>
    %cst_9 = arith.constant 9.99999974E-6 : f32
    %19 = vector.broadcast %cst_9 : f32 to vector<8x1xf32>
    %20 = arith.addf %16, %19 : vector<8x1xf32>
    %21 = math.rsqrt %20 : vector<8x1xf32>
    %22 = vector.broadcast %21 : vector<8x1xf32> to vector<8x32xf32>
    %23 = arith.mulf %18, %22 : vector<8x32xf32>
    %24 = vector.broadcast %2 : vector<1x32xf32> to vector<8x32xf32>
    %25 = arith.mulf %23, %24 : vector<8x32xf32>
    %26 = vector.broadcast %3 : vector<1x32xf32> to vector<8x32xf32>
    %27 = arith.addf %25, %26 : vector<8x32xf32>
    %28 = arith.truncf %27 : vector<8x32xf32> to vector<8x32xbf16>
    %c0_10 = arith.constant 0 : index
    %c0_11 = arith.constant 0 : index
    %29 = vector.load %arg5[%c0_10, %c0_11] : memref<32x32xbf16, #tpu.memory_space<vmem>>, vector<32x32xbf16>
    %cst_12 = arith.constant dense<0.000000e+00> : vector<8x32xf32>
    %30 = tpu.matmul %28, %29, %cst_12 {dimension_numbers = #tpu.dot_dimension_numbers<[1], [0], [0], [1], [0, 0, 1, 1], [], []>} : vector<8x32xbf16>, vector<32x32xbf16>, vector<8x32xf32> -> vector<8x32xf32>
    %c0_13 = arith.constant 0 : index
    %c0_14 = arith.constant 0 : index
    %31 = vector.load %arg6[%c0_13, %c0_14] : memref<1x32xf32, #tpu.memory_space<vmem>>, vector<1x32xf32>
    %32 = vector.broadcast %31 : vector<1x32xf32> to vector<8x32xf32>
    %33 = arith.addf %30, %32 : vector<8x32xf32>
    %c0_15 = arith.constant 0 : index
    %c0_16 = arith.constant 0 : index
    %34 = vector.load %arg7[%c0_15, %c0_16] : memref<32x32xbf16, #tpu.memory_space<vmem>>, vector<32x32xbf16>
    %cst_17 = arith.constant dense<0.000000e+00> : vector<8x32xf32>
    %35 = tpu.matmul %28, %34, %cst_17 {dimension_numbers = #tpu.dot_dimension_numbers<[1], [0], [0], [1], [0, 0, 1, 1], [], []>} : vector<8x32xbf16>, vector<32x32xbf16>, vector<8x32xf32> -> vector<8x32xf32>
    %c0_18 = arith.constant 0 : index
    %c0_19 = arith.constant 0 : index
    %36 = vector.load %arg8[%c0_18, %c0_19] : memref<1x32xf32, #tpu.memory_space<vmem>>, vector<1x32xf32>
    %37 = vector.broadcast %36 : vector<1x32xf32> to vector<8x32xf32>
    %38 = arith.addf %35, %37 : vector<8x32xf32>
    %39 = arith.truncf %33 : vector<8x32xf32> to vector<8x32xbf16>
    %c0_20 = arith.constant 0 : index
    %c0_21 = arith.constant 0 : index
    %c0_22 = arith.constant 0 : index
    %40 = vector.load %arg9[%c0_20, %c0_21, %c0_22] : memref<1x8x32xbf16, #tpu.memory_space<vmem>>, vector<1x8x32xbf16>
    %41 = vector.shape_cast %40 : vector<1x8x32xbf16> to vector<8x32xbf16>
    %42 = vector.shape_cast %39 : vector<8x32xbf16> to vector<1x8x32xbf16>
    tpu.vector_store %arg9[%c0_20, %c0_21, %c0_22], %42 {strides = array<i32>} : memref<1x8x32xbf16, #tpu.memory_space<vmem>>, vector<1x8x32xbf16>,
    %43 = arith.truncf %38 : vector<8x32xf32> to vector<8x32xbf16>
    %c0_23 = arith.constant 0 : index
    %c0_24 = arith.constant 0 : index
    %c0_25 = arith.constant 0 : index
    %44 = vector.load %arg10[%c0_23, %c0_24, %c0_25] : memref<1x8x32xbf16, #tpu.memory_space<vmem>>, vector<1x8x32xbf16>
    %45 = vector.shape_cast %44 : vector<1x8x32xbf16> to vector<8x32xbf16>
    %46 = vector.shape_cast %43 : vector<8x32xbf16> to vector<1x8x32xbf16>
    tpu.vector_store %arg10[%c0_23, %c0_24, %c0_25], %46 {strides = array<i32>} : memref<1x8x32xbf16, #tpu.memory_space<vmem>>, vector<1x8x32xbf16>,
    return
  }
  func.func @transform_0(%arg0: i32, %arg1: i32) -> (i32, i32, i32) {
    %c0_i32 = arith.constant 0 : i32
    %c0_i32_0 = arith.constant 0 : i32
    return %arg0, %arg1, %c0_i32 : i32, i32, i32
  }
  func.func @transform_1(%arg0: i32, %arg1: i32) -> (i32, i32) {
    %c0_i32 = arith.constant 0 : i32
    %c0_i32_0 = arith.constant 0 : i32
    %c0_i32_1 = arith.constant 0 : i32
    return %c0_i32, %c0_i32_0 : i32, i32
  }
  func.func @transform_2(%arg0: i32, %arg1: i32) -> (i32, i32) {
    %c0_i32 = arith.constant 0 : i32
    %c0_i32_0 = arith.constant 0 : i32
    %c0_i32_1 = arith.constant 0 : i32
    return %c0_i32, %c0_i32_0 : i32, i32
  }
  func.func @transform_3(%arg0: i32, %arg1: i32) -> (i32, i32) {
    %c0_i32 = arith.constant 0 : i32
    %c0_i32_0 = arith.constant 0 : i32
    %c0_i32_1 = arith.constant 0 : i32
    return %c0_i32, %c0_i32_0 : i32, i32
  }
  func.func @transform_4(%arg0: i32, %arg1: i32) -> (i32, i32) {
    %c0_i32 = arith.constant 0 : i32
    %c0_i32_0 = arith.constant 0 : i32
    %c0_i32_1 = arith.constant 0 : i32
    return %c0_i32, %c0_i32_0 : i32, i32
  }
  func.func @transform_5(%arg0: i32, %arg1: i32) -> (i32, i32) {
    %c0_i32 = arith.constant 0 : i32
    %c0_i32_0 = arith.constant 0 : i32
    %c0_i32_1 = arith.constant 0 : i32
    return %c0_i32, %c0_i32_0 : i32, i32
  }
  func.func @transform_6(%arg0: i32, %arg1: i32) -> (i32, i32) {
    %c0_i32 = arith.constant 0 : i32
    %c0_i32_0 = arith.constant 0 : i32
    %c0_i32_1 = arith.constant 0 : i32
    return %c0_i32, %c0_i32_0 : i32, i32
  }
  func.func @transform_7(%arg0: i32, %arg1: i32) -> (i32, i32, i32) {
    %c0_i32 = arith.constant 0 : i32
    %c0_i32_0 = arith.constant 0 : i32
    return %arg0, %arg1, %c0_i32 : i32, i32, i32
  }
  func.func @transform_8(%arg0: i32, %arg1: i32) -> (i32, i32, i32) {
    %c0_i32 = arith.constant 0 : i32
    %c0_i32_0 = arith.constant 0 : i32
    return %arg0, %arg1, %c0_i32 : i32, i32, i32
  }
}

</mosaic_0001>

<bundles_post_ra>
// kernel: tpu_custom_call.1
= control target key start
LH: loop header
LB: loop body
LE: loop exit
PB: predicated region body
PF: predicated region fallthrough
CT: control target
= control target key end

     0   :  { %s1746_s0 = inlined_call_operand.hbm [shape: f32[2,8,32], index: 0, kind: input, shape index: {}]   ;;  %s1747_s1 = inlined_call_operand.hbm [shape: f32[1,32], index: 1, kind: input, shape index: {}]   ;;  %s1748_s2 = inlined_call_operand.hbm [shape: f32[1,32], index: 2, kind: input, shape index: {}]   ;;  %s1749_s3 = inlined_call_operand.hbm [shape: bf16[32,32], index: 3, kind: input, shape index: {}]   ;;  %s1750_s4 = inlined_call_operand.hbm [shape: f32[1,32], index: 4, kind: input, shape index: {}]   ;;  %s1751_s5 = inlined_call_operand.hbm [shape: bf16[32,32], index: 5, kind: input, shape index: {}]   ;;  %s1752_s6 = inlined_call_operand.hbm [shape: f32[1,32], index: 6, kind: input, shape index: {}]   ;;  %s1753_s7 = inlined_call_operand.hbm [shape: bf16[2,8,32], index: 7, kind: output, shape index: {0}]   ;;  %s1754_s8 = inlined_call_operand.hbm [shape: bf16[2,8,32], index: 8, kind: output, shape index: {1}]  }
   0x1   :  { %1761 = sst [smem:[#allocation23_spill]] %s1747_s1 }
   0x2   :  { %1762 = sst [smem:[#allocation24_spill]] %s1749_s3 }
   0x3   :  { %1763 = sst [smem:[#allocation25_spill]] %s1754_s8 }
   0x4   :  { %14 = vsyncpa [#allocation3], 0 }
   0x5   :  { %16 = vsyncpa [#allocation3 + $0x1], 0 }
   0x6   :  { %17 = vsyncpa [#allocation6], 0 }
   0x7   :  { %18 = vsyncpa [#allocation9], 0 }
   0x8   :  { %19 = vsyncpa [#allocation12], 0 }
   0x9   :  { %20 = vsyncpa [#allocation4], 0 }
   0xa   :  { %22 = vsyncpa [#allocation4 + $0x1], 0 }
   0xb   :  { %23 = vsyncpa [#allocation16], 0 }
   0xc   :  { %25 = vsyncpa [#allocation16 + $0x1], 0  ;;  %s1384_s27 = smov 0   ;;  %s1386_s28 = smov 0  }
   0xd   :  { %s1388_s29 = smov 0   ;;  %s1390_s30 = smov 0  }
   0xe   :  { %s1392_s9 = smov 0   ;;  %s1394_s10 = smov 0  }
   0xf LB: > { %s1758_s11 = sadd.s32 4294967295, %s1324_s10   ;;  %p804_p0 = scmp.ge.s32.totalorder %s1324_s10, 1  ;;  %s1324_s10 = sphi %s1394_s10, %s31_s10   ;;  %s1320_s9 = sphi %s1392_s9, %s1787_s9   ;;  %s1316_s30 = sphi %s1390_s30, %s1786_s30   ;;  %s1312_s29 = sphi %s1388_s29, %s1785_s29   ;;  %s1308_s28 = sphi %s1386_s28, %s1784_s28   ;;  %s1304_s27 = sphi %s1384_s27, %s1783_s27  }
  0x10   : > { %p1418_p1 = scmp.eq.s32.totalorder %s1758_s11, 0  ;;  %p258_p2 = scmp.lt.s32.totalorder %s1324_s10, 3 }
  0x11   : > { %s1326_s14 = smov [#allocation5]   ;;  %s1327_s16 = smov [#allocation8]  }
  0x12   : > { %s1764_s12 = scalar_select %p1418_p1, 1, 0 }
  0x13   : > { %p1423_p3 = pnand %p804_p0, %p258_p2  ;;  %s271_s15 = sshll.u32 %s1326_s14, 4  ;;  %s272_s15 = int_to_ptr.vmem [resolvable:$true] %s271_s15 }
  0x14   : > { %s292_s17 = sshll.u32 %s1327_s16, 4  ;;  %s1328_s19 = smov [#allocation11]   ;;  %s1436_s17 = int_to_ptr.vmem [resolvable:$true] %s292_s17 }
  0x15   : > { %s1765_s13 = scalar_select %p1423_p3, 1, 0 }
  0x16   : > { %p892_p5 = pneg %p1423_p3  ;;  %s1438_s20 = sshll.u32 %s1328_s19, 4  ;;  %s317_s20 = int_to_ptr.vmem [resolvable:$true] %s1438_s20 }
  0x17   : > { %s1767_s1 = sld [smem:[#allocation23_spill]] }
  0x18   : > { %p1432_p6 = pnand %p892_p5, %p1418_p1 }
  0x1a   : > { %p1448_p8 = pneg %p1432_p6 }
  0x1d   : > { %s1000_s23 = scalar_lea.hbm %s1767_s1, 16 }
  0x1e   : > { %p1001_p7 = scmp.ne.s32.totalorder %s1767_s1, %s1000_s23  ;;  %p1007_p11 = scmp.lt.u32.totalorder %s1000_s23, %s1767_s1 }
  0x20   : > { %p1003_p9 = pnand %p1448_p8, %p1001_p7 }
  0x22   : > { %p1004_p10 = pneg %p1003_p9 }
  0x24   : > { %p1009_p12 = pnand %p1007_p11, %p1004_p10 }
  0x26   : > { %1012 = shalt.err (!%p1009_p12)
}
  0x27   : > { %s1013_s19 = scalar_lea.vmem %s272_s15, 16  ;;  %s1020_s21 = scalar_lea.vmem %s272_s15, 32 }
  0x28   : > { %p1014_p13 = scmp.ne.s32.totalorder %s272_s15, %s1013_s19  ;;  %p1021_p5 = scmp.lt.s32.totalorder %s272_s15, %s272_s15 }
  0x29   : > { %p1022_p4 = scmp.lt.s32.totalorder %s1020_s21, %s1013_s19 }
  0x2a   : > { %p1016_p0 = pnand %p1014_p13, %p1448_p8 }
  0x2b   : > { %p1023_p3 = por %p1022_p4, %p1021_p5 }
  0x2c   : > { %p1017_p2 = pneg %p1016_p0 }
  0x2e   : > { %p1024_p1 = pnand %p1023_p3, %p1017_p2 }
  0x30   : > { %1027 = shalt.err (!%p1024_p1)
}
  0x31   : > { %895 = dma.hbm_to_vmem [thread:$0]  (!%p1432_p6), %s1767_s1, 16, %s272_s15, [#allocation6]  }
  0x32   : > { %s1769_s3 = sld [smem:[#allocation24_spill]] }
  0x38   : > { %s1028_s14 = scalar_lea.hbm %s1769_s3, 256 }
  0x39   : > { %p1029_p7 = scmp.ne.s32.totalorder %s1769_s3, %s1028_s14  ;;  %p1035_p1 = scmp.lt.u32.totalorder %s1028_s14, %s1769_s3 }
  0x3b   : > { %p1031_p9 = pnand %p1029_p7, %p1448_p8 }
  0x3d   : > { %p1032_p4 = pneg %p1031_p9 }
  0x3f   : > { %p1037_p3 = pnand %p1035_p1, %p1032_p4 }
  0x41   : > { %1040 = shalt.err (!%p1037_p3)
}
  0x42   : > { %s1041_s15 = scalar_lea.vmem %s1436_s17, 256  ;;  %p1049_p13 = scmp.lt.s32.totalorder %s1436_s17, %s1436_s17 }
  0x43   : > { %p1042_p10 = scmp.ne.s32.totalorder %s1436_s17, %s1041_s15  ;;  %p1050_p0 = scmp.lt.s32.totalorder %s1041_s15, %s1041_s15 }
  0x45   : > { %p1044_p11 = pnand %p1042_p10, %p1448_p8  ;;  %p1051_p2 = por %p1050_p0, %p1049_p13 }
  0x47   : > { %p1045_p12 = pneg %p1044_p11 }
  0x49   : > { %p1052_p5 = pnand %p1051_p2, %p1045_p12 }
  0x4b   : > { %1055 = shalt.err (!%p1052_p5)
}
  0x4c   : > { %s1329_s11 = smov 64   ;;  %s1330_s22 = smov 4  }
  0x4d   : > { %901 = dma.hbm_to_vmem [thread:$0]  (!%p1432_p6), %s1769_s3, 256, %s1436_s17, [#allocation9], %s1329_s11, %s1329_s11, %s1330_s22  }
  0x4e   : > { %s1056_s16 = scalar_lea.hbm %s1751_s5, 256 }
  0x4f   : > { %p1057_p7 = scmp.ne.s32.totalorder %s1751_s5, %s1056_s16  ;;  %p1063_p1 = scmp.lt.u32.totalorder %s1056_s16, %s1751_s5 }
  0x51   : > { %p1059_p9 = pnand %p1057_p7, %p1448_p8 }
  0x53   : > { %p1060_p4 = pneg %p1059_p9 }
  0x55   : > { %p1065_p3 = pnand %p1063_p1, %p1060_p4 }
  0x57   : > { %1068 = shalt.err (!%p1065_p3)
}
  0x58   : > { %s1069_s24 = scalar_lea.vmem %s317_s20, 256  ;;  %p1077_p13 = scmp.lt.s32.totalorder %s317_s20, %s317_s20 }
  0x59   : > { %p1070_p10 = scmp.ne.s32.totalorder %s317_s20, %s1069_s24  ;;  %p1078_p0 = scmp.lt.s32.totalorder %s1069_s24, %s1069_s24 }
  0x5b   : > { %p1072_p11 = pnand %p1070_p10, %p1448_p8  ;;  %p1079_p2 = por %p1078_p0, %p1077_p13 }
  0x5d   : > { %p1073_p12 = pneg %p1072_p11 }
  0x5f   : > { %p1080_p5 = pnand %p1079_p2, %p1073_p12 }
  0x61   : > { %1083 = shalt.err (!%p1080_p5)
}
  0x62   : > { %907 = dma.hbm_to_vmem [thread:$0]  (!%p1432_p6), %s1751_s5, 256, %s317_s20, [#allocation12], %s1329_s11, %s1329_s11, %s1330_s22  }
  0x63   : > { %s1331_s1 = smov [#allocation7]   ;;  %s1332_s14 = smov [#allocation10]  }
  0x64   : > { %s282_s25 = sshll.u32 %s1331_s1, 4  ;;  %s306_s16 = sshll.u32 %s1332_s14, 4  ;;  %s283_s25 = int_to_ptr.vmem [resolvable:$true] %s282_s25  ;;  %s307_s16 = int_to_ptr.vmem [resolvable:$true] %s306_s16 }
  0x65   : > { %s1084_s15 = scalar_lea.hbm %s1748_s2, 16 }
  0x66   : > { %p1085_p7 = scmp.ne.s32.totalorder %s1748_s2, %s1084_s15  ;;  %p1091_p1 = scmp.lt.u32.totalorder %s1084_s15, %s1748_s2 }
  0x68   : > { %p1087_p9 = pnand %p1085_p7, %p1448_p8 }
  0x6a   : > { %p1088_p4 = pneg %p1087_p9 }
  0x6c   : > { %p1093_p3 = pnand %p1091_p1, %p1088_p4 }
  0x6e   : > { %1096 = shalt.err (!%p1093_p3)
}
  0x6f   : > { %s1097_s20 = scalar_lea.vmem %s283_s25, 16  ;;  %s1104_s11 = scalar_lea.vmem %s283_s25, 32 }
  0x70   : > { %p1098_p10 = scmp.ne.s32.totalorder %s283_s25, %s1097_s20  ;;  %p1105_p13 = scmp.lt.s32.totalorder %s283_s25, %s283_s25 }
  0x71   : > { %p1106_p0 = scmp.lt.s32.totalorder %s1104_s11, %s1097_s20 }
  0x72   : > { %p1100_p11 = pnand %p1098_p10, %p1448_p8 }
  0x73   : > { %p1107_p2 = por %p1106_p0, %p1105_p13 }
  0x74   : > { %p1101_p12 = pneg %p1100_p11 }
  0x76   : > { %p1108_p5 = pnand %p1107_p2, %p1101_p12 }
  0x78   : > { %1111 = shalt.err (!%p1108_p5)
}
  0x79   : > { %898 = dma.hbm_to_vmem [thread:$0]  (!%p1432_p6), %s1748_s2, 16, %s283_s25, [#allocation6]  }
  0x7a   : > { %s1112_s1 = scalar_lea.hbm %s1750_s4, 16 }
  0x7b   : > { %p1113_p7 = scmp.ne.s32.totalorder %s1750_s4, %s1112_s1  ;;  %p1119_p1 = scmp.lt.u32.totalorder %s1112_s1, %s1750_s4 }
  0x7d   : > { %p1115_p9 = pnand %p1113_p7, %p1448_p8 }
  0x7f   : > { %p1116_p4 = pneg %p1115_p9 }
  0x81   : > { %p1121_p3 = pnand %p1119_p1, %p1116_p4 }
  0x83   : > { %1124 = shalt.err (!%p1121_p3)
}
  0x84   : > { %s1125_s24 = scalar_lea.vmem %s307_s16, 16  ;;  %s1132_s25 = scalar_lea.vmem %s307_s16, 32 }
  0x85   : > { %p1126_p10 = scmp.ne.s32.totalorder %s307_s16, %s1125_s24  ;;  %p1133_p13 = scmp.lt.s32.totalorder %s307_s16, %s307_s16 }
  0x86   : > { %p1134_p0 = scmp.lt.s32.totalorder %s1132_s25, %s1125_s24 }
  0x87   : > { %p1128_p11 = pnand %p1126_p10, %p1448_p8 }
  0x88   : > { %p1135_p2 = por %p1134_p0, %p1133_p13 }
  0x89   : > { %p1129_p12 = pneg %p1128_p11 }
  0x8b   : > { %p1136_p5 = pnand %p1135_p2, %p1129_p12 }
  0x8d   : > { %1139 = shalt.err (!%p1136_p5)
}
  0x8e   : > { %904 = dma.hbm_to_vmem [thread:$0]  (!%p1432_p6), %s1750_s4, 16, %s307_s16, [#allocation9]  }
  0x8f   : > { %s1333_s11 = smov [#allocation13]   ;;  %s1140_s23 = scalar_lea.hbm %s1752_s6, 16 }
  0x90   : > { %s330_s3 = sshll.u32 %s1333_s11, 4  ;;  %p1141_p7 = scmp.ne.s32.totalorder %s1752_s6, %s1140_s23  ;;  %s331_s3 = int_to_ptr.vmem [resolvable:$true] %s330_s3 }
  0x91   : > { %p1147_p1 = scmp.lt.u32.totalorder %s1140_s23, %s1752_s6 }
  0x92   : > { %p1143_p9 = pnand %p1141_p7, %p1448_p8 }
  0x94   : > { %p1144_p4 = pneg %p1143_p9 }
  0x96   : > { %p1149_p3 = pnand %p1147_p1, %p1144_p4 }
  0x98   : > { %1152 = shalt.err (!%p1149_p3)
}
  0x99   : > { %s1153_s16 = scalar_lea.vmem %s331_s3, 16  ;;  %s1160_s15 = scalar_lea.vmem %s331_s3, 32 }
  0x9a   : > { %p1154_p10 = scmp.ne.s32.totalorder %s331_s3, %s1153_s16  ;;  %p1161_p13 = scmp.lt.s32.totalorder %s331_s3, %s331_s3 }
  0x9b   : > { %p1162_p0 = scmp.lt.s32.totalorder %s1160_s15, %s1153_s16 }
  0x9c   : > { %p1156_p11 = pnand %p1154_p10, %p1448_p8 }
  0x9d   : > { %p1163_p2 = por %p1162_p0, %p1161_p13 }
  0x9e   : > { %p1157_p12 = pneg %p1156_p11 }
  0xa0   : > { %p1164_p5 = pnand %p1163_p2, %p1157_p12 }
  0xa2   : > { %1167 = shalt.err (!%p1164_p5)
}
  0xa3   : > { %910 = dma.hbm_to_vmem [thread:$0]  (!%p1432_p6), %s1752_s6, 16, %s331_s3, [#allocation12]  }
  0xa4   : > { %s803_s26 = sadd.s32 4294967294, %s1324_s10   ;;  %s43_s17 = sadd.s32 1, %s1320_s9 }
  0xa5   : > { %p45_p8 = scmp.ge.s32.totalorder %s43_s17, 2  ;;  %s52_s18 = sadd.s32 1, %s1312_s29 }
  0xa6   : > { %p59_p7 = scmp.ne.s32.totalorder %s1312_s29, %s1308_s28  ;;  %p60_p9 = scmp.eq.s32.totalorder %s1324_s10, 0 }
  0xa7   : > { %s1789_s17 = smov (%p45_p8, %s43_s17), 0  ;;  %p65_p1 = scmp.ne.s32.totalorder %s1308_s28, %s1304_s27 }
  0xa8   : > { %p1568_p4 = por %p60_p9, %p59_p7  ;;  %s47_s11 = ssub.s32 %s1320_s9, %s1789_s17 }
  0xa9   : > { %s1771_s3 = sadd.s32 4294967295, %s1324_s10   ;;  %p50_p3 = scmp.eq.s32.totalorder %s47_s11, 0 }
  0xaa   : > { %p217_p6 = scmp.eq.s32.totalorder %s1771_s3, 1  ;;  %p1772_p10 = scmp.ne.s32.totalorder %s1764_s12, 0 }
  0xab   : > { %p223_p13 = scmp.eq.s32.totalorder %s803_s26, 1  ;;  %p928_p2 = scmp.lt.s32.totalorder %s1324_s10, 2 }
  0xac   : > { %p1580_p11 = por %p1772_p10, %p65_p1  ;;  %p1584_p12 = por %p217_p6, %p59_p7 }
  0xad   : > { %s1589_s23 = scalar_select %p50_p3, %s1312_s29, %s52_s18  }
  0xae   : > { %s1774_s8 = scalar_select %p1584_p12, 1, 0 }
  0xaf   : > { %p1591_p0 = por %p223_p13, %p65_p1  ;;  %s341_s14 = sand.u32 1, %s1312_s29  }
  0xb0   : > { %s813_s19 = sshll.u32 %s1320_s9, 7  ;;  %s812_s21 = sshll.u32 %s341_s14, 3 }
  0xb1   : > { %s1775_s1 = scalar_select %p1591_p0, 1, 0 }
  0xb2   : > { %s1601_s24 = scalar_lea.hbm %s1746_s0, %s813_s19  ;;  %s345_s25 = scalar_lea.vmem [#allocation2], %s812_s21 }
  0xb3   : > { %s353_s26 = sshll.u32 %s345_s25, 4  ;;  %p1605_p5 = pnand %p928_p2, %p1568_p4  ;;  %s1609_s26 = int_to_ptr.vmem [resolvable:$true] %s353_s26 }
  0xb4   : > { %s342_s11 = scalar_lea.sflag [#allocation3], %s341_s14  ;;  %s1168_s3 = scalar_lea.hbm %s1601_s24, 128 }
  0xb5   : > { %p1169_p8 = scmp.ne.s32.totalorder %s1601_s24, %s1168_s3  ;;  %p1170_p7 = pneg %p1605_p5 }
  0xb6   : > { %s1173_s20 = scalar_lea.hbm %s1746_s0, 256  ;;  %p1174_p4 = scmp.lt.u32.totalorder %s1601_s24, %s1746_s0 }
  0xb7   : > { %p1171_p9 = pnand %p1170_p7, %p1169_p8  ;;  %p1175_p6 = scmp.lt.u32.totalorder %s1173_s20, %s1168_s3 }
  0xb8   : > { %p1177_p10 = scmp.lt.u32.totalorder %s1168_s3, %s1601_s24 }
  0xb9   : > { %p1172_p1 = pneg %p1171_p9  ;;  %p1176_p3 = por %p1175_p6, %p1174_p4 }
  0xbb   : > { %p1178_p13 = por %p1177_p10, %p1176_p3 }
  0xbd   : > { %p1179_p2 = pnand %p1178_p13, %p1172_p1 }
  0xbf   : > { %1182 = shalt.err (!%p1179_p2)
}
  0xc0   : > { %s1183_s14 = scalar_lea.vmem %s1609_s26, 128  ;;  %s1334_s25 = smov [#allocation2]  }
  0xc1   : > { %p1184_p8 = scmp.ne.s32.totalorder %s1609_s26, %s1183_s14  ;;  %s1188_s19 = sshll.u32 %s1334_s25, 4  ;;  %s1189_s19 = int_to_ptr.vmem [resolvable:$false] %s1188_s19 }
  0xc2   : > { %s1190_s21 = scalar_lea.vmem %s1189_s19, 256  ;;  %p1191_p12 = scmp.lt.s32.totalorder %s1609_s26, %s1189_s19 }
  0xc3   : > { %p1186_p9 = pnand %p1184_p8, %p1170_p7  ;;  %p1192_p4 = scmp.lt.s32.totalorder %s1190_s21, %s1183_s14 }
  0xc5   : > { %p1187_p0 = pneg %p1186_p9  ;;  %p1193_p6 = por %p1192_p4, %p1191_p12 }
  0xc7   : > { %p1194_p3 = pnand %p1193_p6, %p1187_p0 }
  0xc9   : > { %1197 = shalt.err (!%p1194_p3)
}
  0xca   : > { %914 = dma.hbm_to_vmem [thread:$0]  (!%p1605_p5), %s1601_s24, 128, %s1609_s26, %s342_s11  }
  0xcb   : > { %p1777_p1 = scmp.ne.s32.totalorder %s1765_s13, 0 }
  0xcc   : > { %s1639_s3 = sand.u32 (!%p1777_p1), 1, %s1308_s28  }
  0xcd   : > { %362 = sbr.rel (%p1777_p1) target bundleno = 789 (0x315), region = 48  ;;  %s815_s20 = sshll.u32 (!%p1777_p1), %s1639_s3, 3 }
  0xce   : > { %s365_s16 = scalar_lea.sflag (!%p1777_p1), [#allocation3], %s1639_s3  ;;  %s368_s15 = scalar_lea.vmem (!%p1777_p1), [#allocation2], %s815_s20 }
  0xd4   : > { %1279 = dma.done.wait (%p1580_p11), %s365_s16, 128  }
  0xd5   : > { %1281 = vsyncadd (%p1580_p11), %s365_s16, 4294967168  ;;  %p1778_p12 = scmp.ne.s32.totalorder %s1764_s12, 0 }
  0xd7   : > { %1283 = dma.done.wait (%p1778_p12), [#allocation6], 32  }
  0xd8   : > { %1285 = vsyncadd (%p1778_p12), [#allocation6], 4294967264 }
  0xd9   : > { %1287 = dma.done.wait (%p1778_p12), [#allocation9], 272  }
  0xda   : > { %1289 = vsyncadd (%p1778_p12), [#allocation9], 4294967024 }
  0xdb   : > { %1291 = dma.done.wait (%p1778_p12), [#allocation12], 272  }
  0xdc   : > { %1293 = vsyncadd (%p1778_p12), [#allocation12], 4294967024  ;;  %vm434_vm0 = vcmask 261120   ;;  %v431_v0 = vld [vmem:[%s368_s15] sm:$0xff]  ;;  %v994_v7 = vld [vmem:[#allocation8] sm:$0xff]   ;;  %v1335_v9 = vmov 0.0  }
  0xdd   : > { %v435_v1 = vsel %vm434_vm0, %v431_v0, 0.0  ;;  %v995_v8 = vld [vmem:[#allocation11] sm:$0xff]   ;;  %846 = vmatprep.subr.bf16.mxu0 %v1335_v9  ;;  %854 = vmatprep.subr.bf16.mxu1 %v1335_v9  ;;  %v996_v10 = vld [vmem:[#allocation8 + $0x8] sm:$0xff]   ;;  %v997_v11 = vld [vmem:[#allocation11 + $0x8] sm:$0xff]   ;;  %vm1336_vm1 = vmmov 0   ;;  %s822_s12 = sshll.u32 %s1639_s3, 2 }
  0xde   : > { %436 = vadd.xlane.f32.xlu0 %v435_v1  ;;  %847 = vmatpush3.bf16.msra.mxu0 %v994_v7  ;;  %v824_v16 = vld [vmem:[#allocation5] ss:$0 sm:$0xff]  ;;  %v825_v18 = vld [vmem:[#allocation7] ss:$0 sm:$0xff]  ;;  %v826_v22 = vld [vmem:[#allocation10] ss:$0 sm:$0xff] }
  0xdf   : > { %855 = vmatpush3.bf16.msra.mxu1 %v995_v8  ;;  %848 = vmatprep.subr.bf16.mxu0 %v1335_v9  ;;  %v830_v23 = vld [vmem:[#allocation13] ss:$0 sm:$0xff]  ;;  %s836_s13 = sshll.u32 %s1316_s30, 6  ;;  %s422_s22 = scalar_lea.vmem [#allocation14], %s822_s12  ;;  %vm594_vm2 = vcmask 257024  }
  0xe0   : > { %856 = vmatprep.subr.bf16.mxu1 %v1335_v9  ;;  %850 = vmatprep.mubr.msk.bf16.mxu0 %vm1336_vm1, %v1335_v9  ;;  %s618_s24 = sshll.u32 %s422_s22, 4  ;;  %s429_s26 = scalar_lea.vmem [#allocation15], %s822_s12  ;;  %s1670_s24 = int_to_ptr.vmem [resolvable:$true] %s618_s24 }
  0xe1   : > { %858 = vmatprep.mubr.msk.bf16.mxu1 %vm1336_vm1, %v1335_v9  ;;  %s632_s18 = sshll.u32 %s429_s26, 4  ;;  %s1668_s25 = scalar_lea.hbm %s1753_s7, %s836_s13  ;;  %s1677_s18 = int_to_ptr.vmem [resolvable:$true] %s632_s18 }
  0xe2   : > { %849 = vmatpush3.bf16.msra.mxu0 %v996_v10  ;;  %s1779_s21 = sld [smem:[#allocation25_spill]]  ;;  %s599_s16 = scalar_lea.sflag [#allocation4], %s1639_s3 }
  0xe3   : > { %857 = vmatpush3.bf16.msra.mxu1 %v997_v11  ;;  %s1198_s15 = scalar_lea.vmem %s1670_s24, 64  ;;  %p1780_p0 = scmp.ne.s32.totalorder %s1774_s8, 0 }
  0xe4   : > { %p1199_p11 = scmp.ne.s32.totalorder %s1670_s24, %s1198_s15  ;;  %s1337_s12 = smov [#allocation14]  }
  0xe5   : > { %s1202_s11 = sshll.u32 %s1337_s12, 4  ;;  %s1203_s11 = int_to_ptr.vmem [resolvable:$false] %s1202_s11 }
  0xe6   : > { %p1200_p5 = pnand %p1199_p11, %p1780_p0  ;;  %s1204_s14 = scalar_lea.vmem %s1203_s11, 128 }
  0xe7   : > { %p1205_p10 = scmp.lt.s32.totalorder %s1670_s24, %s1203_s11  ;;  %p1206_p13 = scmp.lt.s32.totalorder %s1204_s14, %s1198_s15 }
  0xe8   : > { %s1675_s20 = scalar_lea.hbm %s1779_s21, %s836_s13  ;;  %p1201_p7 = pneg %p1200_p5 }
  0xe9   : > { %p1207_p2 = por %p1206_p13, %p1205_p10 }
  0xeb   : > { %p1208_p8 = pnand %p1207_p2, %p1201_p7 }
 0x16b   : > { %v437_v2 = vpop.xlane.xlu0 %436 }
 0x16c   : > { %v439_v3 = vmul.f32 0.03125, %v437_v2 }
 0x16e   : > { %v440_v4 = vsub.f32 %v431_v0, %v439_v3 }
 0x170   : > { %v441_v5 = vmul.f32 %v440_v4, %v440_v4 }
 0x172   : > { %v442_v6 = vsel %vm434_vm0, %v441_v5, 0.0 }
 0x173   : > { %443 = vadd.xlane.f32.xlu0 %v442_v6 }
 0x200   : > { %v444_v12 = vpop.xlane.xlu0 %443 }
 0x201   : > { %v445_v13 = vmul.f32 0.03125, %v444_v12 }
 0x203   : > { %v446_v14 = vadd.f32 1e-05, %v445_v13 }
 0x205   : > { %998 = vrsqrt.f32 %v446_v14 }
 0x20f   : > { %v999_v15 = vpop.eup %998 }
 0x210   : > { %v448_v17 = vmul.f32 %v999_v15, %v440_v4 }
 0x212   : > { %v455_v19 = vmul.f32 %v824_v16, %v448_v17 }
 0x214   : > { %v462_v20 = vadd.f32 %v825_v18, %v455_v19 }
 0x216   : > { %v463_v21 = vpack.c.bf16 %v462_v20, %v462_v20 }
 0x218   : > { %851 = vmatmul.mubr.msk.bf16.vlgmr.msra.gmra.mrb[0].mxu0 %vm434_vm0, %v463_v21  ;;  %859 = vmatmul.mubr.msk.bf16.vlgmr.msra.gmra.mrb[0].mxu1 %vm434_vm0, %v463_v21 }
 0x2eb   : > { %v524_v24 = vpop.f32.mrb[0].mxu0  ;;  %v587_v25 = vpop.f32.mrb[0].mxu1 }
 0x2ec   : > { %v525_v26 = vadd.f32 %v826_v22, %v524_v24  ;;  %v588_v27 = vadd.f32 %v830_v23, %v587_v25  ;;  %v852_v28 = vpop.f32.mrb[1].mxu0  ;;  %v860_v29 = vpop.f32.mrb[1].mxu1 }
 0x2ed   : > { %v527_v30 = vpop.f32.mrb[2].mxu0  ;;  %v590_v31 = vpop.f32.mrb[2].mxu1 }
 0x2ee   : > { %v593_v32 = vpack.c.bf16 %v525_v26, %v525_v26  ;;  %v596_v33 = vpack.c.bf16 %v588_v27, %v588_v27  ;;  %v853_v34 = vpop.f32.mrb[3].mxu0  ;;  %v861_v35 = vpop.f32.mrb[3].mxu1 }
 0x2f0   : > { %595 = vst.msk [vmem:[%s422_s22] sm:$0xf] %vm594_vm2, %v593_v32  ;;  %597 = vst.msk [vmem:[%s429_s26] sm:$0xf] %vm594_vm2, %v596_v33 }
 0x2f1   : > { %1211 = shalt.err (!%p1208_p8)
}
 0x2f2   : > { %s1212_s13 = scalar_lea.hbm %s1668_s25, 64  ;;  %s1216_s30 = scalar_lea.hbm %s1753_s7, 128 }
 0x2f3   : > { %p1213_p9 = scmp.ne.s32.totalorder %s1668_s25, %s1212_s13  ;;  %p1217_p3 = scmp.lt.u32.totalorder %s1668_s25, %s1753_s7 }
 0x2f4   : > { %p1218_p1 = scmp.lt.u32.totalorder %s1216_s30, %s1212_s13  ;;  %p1220_p11 = scmp.lt.u32.totalorder %s1212_s13, %s1668_s25 }
 0x2f5   : > { %p1214_p4 = pnand %p1213_p9, %p1780_p0 }
 0x2f6   : > { %p1219_p12 = por %p1218_p1, %p1217_p3 }
 0x2f7   : > { %p1215_p6 = pneg %p1214_p4 }
 0x2f8   : > { %p1221_p5 = por %p1220_p11, %p1219_p12 }
 0x2fa   : > { %p1222_p7 = pnand %p1221_p5, %p1215_p6 }
 0x2fc   : > { %1225 = shalt.err (!%p1222_p7)
}
 0x2fd   : > { %888 = dma.vmem_to_hbm [thread:$0]  (%p1780_p0), %s1670_s24, 64, %s1668_s25, %s599_s16  }
 0x2fe   : > { %s604_s15 = scalar_lea.sflag [#allocation16], %s1639_s3  ;;  %s1226_s11 = scalar_lea.vmem %s1677_s18, 64 }
 0x2ff   : > { %p1227_p10 = scmp.ne.s32.totalorder %s1677_s18, %s1226_s11  ;;  %s1338_s14 = smov [#allocation15]  }
 0x300   : > { %s1230_s13 = sshll.u32 %s1338_s14, 4  ;;  %s1231_s13 = int_to_ptr.vmem [resolvable:$false] %s1230_s13 }
 0x301   : > { %p1228_p13 = pnand %p1227_p10, %p1780_p0  ;;  %s1232_s22 = scalar_lea.vmem %s1231_s13, 128 }
 0x302   : > { %p1233_p8 = scmp.lt.s32.totalorder %s1677_s18, %s1231_s13  ;;  %p1234_p9 = scmp.lt.s32.totalorder %s1232_s22, %s1226_s11 }
 0x303   : > { %p1229_p2 = pneg %p1228_p13 }
 0x304   : > { %p1235_p4 = por %p1234_p9, %p1233_p8 }
 0x306   : > { %p1236_p6 = pnand %p1235_p4, %p1229_p2 }
 0x308   : > { %1239 = shalt.err (!%p1236_p6)
}
 0x309   : > { %s1240_s3 = scalar_lea.hbm %s1675_s20, 64  ;;  %s1244_s16 = scalar_lea.hbm %s1779_s21, 128 }
 0x30a   : > { %p1241_p3 = scmp.ne.s32.totalorder %s1675_s20, %s1240_s3  ;;  %p1245_p11 = scmp.lt.u32.totalorder %s1675_s20, %s1779_s21 }
 0x30b   : > { %p1246_p5 = scmp.lt.u32.totalorder %s1244_s16, %s1240_s3  ;;  %p1248_p10 = scmp.lt.u32.totalorder %s1240_s3, %s1675_s20 }
 0x30c   : > { %p1242_p1 = pnand %p1241_p3, %p1780_p0 }
 0x30d   : > { %p1247_p7 = por %p1246_p5, %p1245_p11 }
 0x30e   : > { %p1243_p12 = pneg %p1242_p1 }
 0x30f   : > { %p1249_p13 = por %p1248_p10, %p1247_p7 }
 0x311   : > { %p1250_p2 = pnand %p1249_p13, %p1243_p12 }
 0x313   : > { %1253 = shalt.err (!%p1250_p2)
}
 0x314   : > { %889 = dma.vmem_to_hbm [thread:$0]  (%p1780_p0), %s1677_s18, 64, %s1675_s20, %s604_s15  }
 0x315 PF: > { %s644_s19 = sand.u32 1, %s1304_s27   ;;  %p1781_p8 = scmp.ne.s32.totalorder %s1775_s1, 0 }
 0x316   : > { %p1782_p9 = scmp.ge.s32.totalorder %s1324_s10, 2  ;;  %s645_s12 = scalar_lea.sflag [#allocation4], %s644_s19 }
 0x318   : > { %p916_p4 = pnand %p1782_p9, %p1781_p8 }
 0x31a   : > { %1295 = dma.done.wait (!%p916_p4), %s645_s12, 64  }
 0x31b   : > { %1297 = vsyncadd (!%p916_p4), %s645_s12, 4294967232  ;;  %s654_s11 = scalar_lea.sflag [#allocation16], %s644_s19 }
 0x31c   : > { %1299 = dma.done.wait (!%p916_p4), %s654_s11, 64  }
 0x31d   : > { %1301 = vsyncadd (!%p916_p4), %s654_s11, 4294967232  ;;  %s31_s10 = sadd.s32 1, %s1324_s10   ;;  %s1783_s27 = smov %s1308_s28 }
 0x31e   : > { %p28_p6 = scmp.ge.s32.totalorder %s31_s10, 4   ;;  %s1784_s28 = smov %s1312_s29 }
 0x31f   : > { %s1785_s29 = smov %s1589_s23  ;;  %s1786_s30 = smov %s1320_s9 }
 0x320   : > { %s1787_s9 = smov %s1789_s17  ;;  %30 = sbr.rel (!%p28_p6) target bundleno = 15 (0xf), region = 134 }
 0x327   :  { %659 = vsyncpa [#allocation3], 1 }
 0x328   :  { %661 = vsyncpa [#allocation3 + $0x1], 1 }
 0x329   :  { %662 = vsyncpa [#allocation6], 1 }
 0x32a   :  { %663 = vsyncpa [#allocation9], 1 }
 0x32b   :  { %664 = vsyncpa [#allocation12], 1 }
 0x32c   :  { %665 = vsyncpa [#allocation4], 1 }
 0x32d   :  { %667 = vsyncpa [#allocation4 + $0x1], 1 }
 0x32e   :  { %668 = vsyncpa [#allocation16], 1 }
 0x32f   :  { %670 = vsyncpa [#allocation16 + $0x1], 1 }

// kernel: tpu_custom_call.1
= control target key start
LH: loop header
LB: loop body
LE: loop exit
PB: predicated region body
PF: predicated region fallthrough
CT: control target
= control target key end

     0   :  { %s1746_s0 = inlined_call_operand.hbm [shape: f32[2,8,32], index: 0, kind: input, shape index: {}]   ;;  %s1747_s1 = inlined_call_operand.hbm [shape: f32[1,32], index: 1, kind: input, shape index: {}]   ;;  %s1748_s2 = inlined_call_operand.hbm [shape: f32[1,32], index: 2, kind: input, shape index: {}]   ;;  %s1749_s3 = inlined_call_operand.hbm [shape: bf16[32,32], index: 3, kind: input, shape index: {}]   ;;  %s1750_s4 = inlined_call_operand.hbm [shape: f32[1,32], index: 4, kind: input, shape index: {}]   ;;  %s1751_s5 = inlined_call_operand.hbm [shape: bf16[32,32], index: 5, kind: input, shape index: {}]   ;;  %s1752_s6 = inlined_call_operand.hbm [shape: f32[1,32], index: 6, kind: input, shape index: {}]   ;;  %s1753_s7 = inlined_call_operand.hbm [shape: bf16[2,8,32], index: 7, kind: output, shape index: {0}]   ;;  %s1754_s8 = inlined_call_operand.hbm [shape: bf16[2,8,32], index: 8, kind: output, shape index: {1}]  }
   0x1   :  { %1761 = sst [smem:[#allocation23_spill]] %s1747_s1 }
   0x2   :  { %1762 = sst [smem:[#allocation24_spill]] %s1749_s3 }
   0x3   :  { %1763 = sst [smem:[#allocation25_spill]] %s1754_s8 }
   0x4   :  { %14 = vsyncpa [#allocation3], 0 }
   0x5   :  { %16 = vsyncpa [#allocation3 + $0x1], 0 }
   0x6   :  { %17 = vsyncpa [#allocation6], 0 }
   0x7   :  { %18 = vsyncpa [#allocation9], 0 }
   0x8   :  { %19 = vsyncpa [#allocation12], 0 }
   0x9   :  { %20 = vsyncpa [#allocation4], 0 }
   0xa   :  { %22 = vsyncpa [#allocation4 + $0x1], 0 }
   0xb   :  { %23 = vsyncpa [#allocation16], 0 }
   0xc   :  { %25 = vsyncpa [#allocation16 + $0x1], 0  ;;  %s1384_s27 = smov 0   ;;  %s1386_s28 = smov 0  }
   0xd   :  { %s1388_s29 = smov 0   ;;  %s1390_s30 = smov 0  }
   0xe   :  { %s1392_s9 = smov 0   ;;  %s1394_s10 = smov 0  }
   0xf LB: > { %s1758_s11 = sadd.s32 4294967295, %s1324_s10   ;;  %p804_p0 = scmp.ge.s32.totalorder %s1324_s10, 1  ;;  %s1324_s10 = sphi %s1394_s10, %s31_s10   ;;  %s1320_s9 = sphi %s1392_s9, %s1787_s9   ;;  %s1316_s30 = sphi %s1390_s30, %s1786_s30   ;;  %s1312_s29 = sphi %s1388_s29, %s1785_s29   ;;  %s1308_s28 = sphi %s1386_s28, %s1784_s28   ;;  %s1304_s27 = sphi %s1384_s27, %s1783_s27  }
  0x10   : > { %p1418_p1 = scmp.eq.s32.totalorder %s1758_s11, 0  ;;  %p258_p2 = scmp.lt.s32.totalorder %s1324_s10, 3 }
  0x11   : > { %s1326_s14 = smov [#allocation5]   ;;  %s1327_s16 = smov [#allocation8]  }
  0x12   : > { %s1764_s12 = scalar_select %p1418_p1, 1, 0 }
  0x13   : > { %p1423_p3 = pnand %p804_p0, %p258_p2  ;;  %s271_s15 = sshll.u32 %s1326_s14, 4  ;;  %s272_s15 = int_to_ptr.vmem [resolvable:$true] %s271_s15 }
  0x14   : > { %s292_s17 = sshll.u32 %s1327_s16, 4  ;;  %s1328_s19 = smov [#allocation11]   ;;  %s1436_s17 = int_to_ptr.vmem [resolvable:$true] %s292_s17 }
  0x15   : > { %s1765_s13 = scalar_select %p1423_p3, 1, 0 }
  0x16   : > { %p892_p5 = pneg %p1423_p3  ;;  %s1438_s20 = sshll.u32 %s1328_s19, 4  ;;  %s317_s20 = int_to_ptr.vmem [resolvable:$true] %s1438_s20 }
  0x17   : > { %s1767_s1 = sld [smem:[#allocation23_spill]] }
  0x18   : > { %p1432_p6 = pnand %p892_p5, %p1418_p1 }
  0x1a   : > { %p1448_p8 = pneg %p1432_p6 }
  0x1d   : > { %s1000_s23 = scalar_lea.hbm %s1767_s1, 16 }
  0x1e   : > { %p1001_p7 = scmp.ne.s32.totalorder %s1767_s1, %s1000_s23  ;;  %p1007_p11 = scmp.lt.u32.totalorder %s1000_s23, %s1767_s1 }
  0x20   : > { %p1003_p9 = pnand %p1448_p8, %p1001_p7 }
  0x22   : > { %p1004_p10 = pneg %p1003_p9 }
  0x24   : > { %p1009_p12 = pnand %p1007_p11, %p1004_p10 }
  0x26   : > { %1012 = shalt.err (!%p1009_p12)
}
  0x27   : > { %s1013_s19 = scalar_lea.vmem %s272_s15, 16  ;;  %s1020_s21 = scalar_lea.vmem %s272_s15, 32 }
  0x28   : > { %p1014_p13 = scmp.ne.s32.totalorder %s272_s15, %s1013_s19  ;;  %p1021_p5 = scmp.lt.s32.totalorder %s272_s15, %s272_s15 }
  0x29   : > { %p1022_p4 = scmp.lt.s32.totalorder %s1020_s21, %s1013_s19 }
  0x2a   : > { %p1016_p0 = pnand %p1014_p13, %p1448_p8 }
  0x2b   : > { %p1023_p3 = por %p1022_p4, %p1021_p5 }
  0x2c   : > { %p1017_p2 = pneg %p1016_p0 }
  0x2e   : > { %p1024_p1 = pnand %p1023_p3, %p1017_p2 }
  0x30   : > { %1027 = shalt.err (!%p1024_p1)
}
  0x31   : > { %895 = dma.hbm_to_vmem [thread:$0]  (!%p1432_p6), %s1767_s1, 16, %s272_s15, [#allocation6]  }
  0x32   : > { %s1769_s3 = sld [smem:[#allocation24_spill]] }
  0x38   : > { %s1028_s14 = scalar_lea.hbm %s1769_s3, 256 }
  0x39   : > { %p1029_p7 = scmp.ne.s32.totalorder %s1769_s3, %s1028_s14  ;;  %p1035_p1 = scmp.lt.u32.totalorder %s1028_s14, %s1769_s3 }
  0x3b   : > { %p1031_p9 = pnand %p1029_p7, %p1448_p8 }
  0x3d   : > { %p1032_p4 = pneg %p1031_p9 }
  0x3f   : > { %p1037_p3 = pnand %p1035_p1, %p1032_p4 }
  0x41   : > { %1040 = shalt.err (!%p1037_p3)
}
  0x42   : > { %s1041_s15 = scalar_lea.vmem %s1436_s17, 256  ;;  %p1049_p13 = scmp.lt.s32.totalorder %s1436_s17, %s1436_s17 }
  0x43   : > { %p1042_p10 = scmp.ne.s32.totalorder %s1436_s17, %s1041_s15  ;;  %p1050_p0 = scmp.lt.s32.totalorder %s1041_s15, %s1041_s15 }
  0x45   : > { %p1044_p11 = pnand %p1042_p10, %p1448_p8  ;;  %p1051_p2 = por %p1050_p0, %p1049_p13 }
  0x47   : > { %p1045_p12 = pneg %p1044_p11 }
  0x49   : > { %p1052_p5 = pnand %p1051_p2, %p1045_p12 }
  0x4b   : > { %1055 = shalt.err (!%p1052_p5)
}
  0x4c   : > { %s1329_s11 = smov 64   ;;  %s1330_s22 = smov 4  }
  0x4d   : > { %901 = dma.hbm_to_vmem [thread:$0]  (!%p1432_p6), %s1769_s3, 256, %s1436_s17, [#allocation9], %s1329_s11, %s1329_s11, %s1330_s22  }
  0x4e   : > { %s1056_s16 = scalar_lea.hbm %s1751_s5, 256 }
  0x4f   : > { %p1057_p7 = scmp.ne.s32.totalorder %s1751_s5, %s1056_s16  ;;  %p1063_p1 = scmp.lt.u32.totalorder %s1056_s16, %s1751_s5 }
  0x51   : > { %p1059_p9 = pnand %p1057_p7, %p1448_p8 }
  0x53   : > { %p1060_p4 = pneg %p1059_p9 }
  0x55   : > { %p1065_p3 = pnand %p1063_p1, %p1060_p4 }
  0x57   : > { %1068 = shalt.err (!%p1065_p3)
}
  0x58   : > { %s1069_s24 = scalar_lea.vmem %s317_s20, 256  ;;  %p1077_p13 = scmp.lt.s32.totalorder %s317_s20, %s317_s20 }
  0x59   : > { %p1070_p10 = scmp.ne.s32.totalorder %s317_s20, %s1069_s24  ;;  %p1078_p0 = scmp.lt.s32.totalorder %s1069_s24, %s1069_s24 }
  0x5b   : > { %p1072_p11 = pnand %p1070_p10, %p1448_p8  ;;  %p1079_p2 = por %p1078_p0, %p1077_p13 }
  0x5d   : > { %p1073_p12 = pneg %p1072_p11 }
  0x5f   : > { %p1080_p5 = pnand %p1079_p2, %p1073_p12 }
  0x61   : > { %1083 = shalt.err (!%p1080_p5)
}
  0x62   : > { %907 = dma.hbm_to_vmem [thread:$0]  (!%p1432_p6), %s1751_s5, 256, %s317_s20, [#allocation12], %s1329_s11, %s1329_s11, %s1330_s22  }
  0x63   : > { %s1331_s1 = smov [#allocation7]   ;;  %s1332_s14 = smov [#allocation10]  }
  0x64   : > { %s282_s25 = sshll.u32 %s1331_s1, 4  ;;  %s306_s16 = sshll.u32 %s1332_s14, 4  ;;  %s283_s25 = int_to_ptr.vmem [resolvable:$true] %s282_s25  ;;  %s307_s16 = int_to_ptr.vmem [resolvable:$true] %s306_s16 }
  0x65   : > { %s1084_s15 = scalar_lea.hbm %s1748_s2, 16 }
  0x66   : > { %p1085_p7 = scmp.ne.s32.totalorder %s1748_s2, %s1084_s15  ;;  %p1091_p1 = scmp.lt.u32.totalorder %s1084_s15, %s1748_s2 }
  0x68   : > { %p1087_p9 = pnand %p1085_p7, %p1448_p8 }
  0x6a   : > { %p1088_p4 = pneg %p1087_p9 }
  0x6c   : > { %p1093_p3 = pnand %p1091_p1, %p1088_p4 }
  0x6e   : > { %1096 = shalt.err (!%p1093_p3)
}
  0x6f   : > { %s1097_s20 = scalar_lea.vmem %s283_s25, 16  ;;  %s1104_s11 = scalar_lea.vmem %s283_s25, 32 }
  0x70   : > { %p1098_p10 = scmp.ne.s32.totalorder %s283_s25, %s1097_s20  ;;  %p1105_p13 = scmp.lt.s32.totalorder %s283_s25, %s283_s25 }
  0x71   : > { %p1106_p0 = scmp.lt.s32.totalorder %s1104_s11, %s1097_s20 }
  0x72   : > { %p1100_p11 = pnand %p1098_p10, %p1448_p8 }
  0x73   : > { %p1107_p2 = por %p1106_p0, %p1105_p13 }
  0x74   : > { %p1101_p12 = pneg %p1100_p11 }
  0x76   : > { %p1108_p5 = pnand %p1107_p2, %p1101_p12 }
  0x78   : > { %1111 = shalt.err (!%p1108_p5)
}
  0x79   : > { %898 = dma.hbm_to_vmem [thread:$0]  (!%p1432_p6), %s1748_s2, 16, %s283_s25, [#allocation6]  }
  0x7a   : > { %s1112_s1 = scalar_lea.hbm %s1750_s4, 16 }
  0x7b   : > { %p1113_p7 = scmp.ne.s32.totalorder %s1750_s4, %s1112_s1  ;;  %p1119_p1 = scmp.lt.u32.totalorder %s1112_s1, %s1750_s4 }
  0x7d   : > { %p1115_p9 = pnand %p1113_p7, %p1448_p8 }
  0x7f   : > { %p1116_p4 = pneg %p1115_p9 }
  0x81   : > { %p1121_p3 = pnand %p1119_p1, %p1116_p4 }
  0x83   : > { %1124 = shalt.err (!%p1121_p3)
}
  0x84   : > { %s1125_s24 = scalar_lea.vmem %s307_s16, 16  ;;  %s1132_s25 = scalar_lea.vmem %s307_s16, 32 }
  0x85   : > { %p1126_p10 = scmp.ne.s32.totalorder %s307_s16, %s1125_s24  ;;  %p1133_p13 = scmp.lt.s32.totalorder %s307_s16, %s307_s16 }
  0x86   : > { %p1134_p0 = scmp.lt.s32.totalorder %s1132_s25, %s1125_s24 }
  0x87   : > { %p1128_p11 = pnand %p1126_p10, %p1448_p8 }
  0x88   : > { %p1135_p2 = por %p1134_p0, %p1133_p13 }
  0x89   : > { %p1129_p12 = pneg %p1128_p11 }
  0x8b   : > { %p1136_p5 = pnand %p1135_p2, %p1129_p12 }
  0x8d   : > { %1139 = shalt.err (!%p1136_p5)
}
  0x8e   : > { %904 = dma.hbm_to_vmem [thread:$0]  (!%p1432_p6), %s1750_s4, 16, %s307_s16, [#allocation9]  }
  0x8f   : > { %s1333_s11 = smov [#allocation13]   ;;  %s1140_s23 = scalar_lea.hbm %s1752_s6, 16 }
  0x90   : > { %s330_s3 = sshll.u32 %s1333_s11, 4  ;;  %p1141_p7 = scmp.ne.s32.totalorder %s1752_s6, %s1140_s23  ;;  %s331_s3 = int_to_ptr.vmem [resolvable:$true] %s330_s3 }
  0x91   : > { %p1147_p1 = scmp.lt.u32.totalorder %s1140_s23, %s1752_s6 }
  0x92   : > { %p1143_p9 = pnand %p1141_p7, %p1448_p8 }
  0x94   : > { %p1144_p4 = pneg %p1143_p9 }
  0x96   : > { %p1149_p3 = pnand %p1147_p1, %p1144_p4 }
  0x98   : > { %1152 = shalt.err (!%p1149_p3)
}
  0x99   : > { %s1153_s16 = scalar_lea.vmem %s331_s3, 16  ;;  %s1160_s15 = scalar_lea.vmem %s331_s3, 32 }
  0x9a   : > { %p1154_p10 = scmp.ne.s32.totalorder %s331_s3, %s1153_s16  ;;  %p1161_p13 = scmp.lt.s32.totalorder %s331_s3, %s331_s3 }
  0x9b   : > { %p1162_p0 = scmp.lt.s32.totalorder %s1160_s15, %s1153_s16 }
  0x9c   : > { %p1156_p11 = pnand %p1154_p10, %p1448_p8 }
  0x9d   : > { %p1163_p2 = por %p1162_p0, %p1161_p13 }
  0x9e   : > { %p1157_p12 = pneg %p1156_p11 }
  0xa0   : > { %p1164_p5 = pnand %p1163_p2, %p1157_p12 }
  0xa2   : > { %1167 = shalt.err (!%p1164_p5)
}
  0xa3   : > { %910 = dma.hbm_to_vmem [thread:$0]  (!%p1432_p6), %s1752_s6, 16, %s331_s3, [#allocation12]  }
  0xa4   : > { %s803_s26 = sadd.s32 4294967294, %s1324_s10   ;;  %s43_s17 = sadd.s32 1, %s1320_s9 }
  0xa5   : > { %p45_p8 = scmp.ge.s32.totalorder %s43_s17, 2  ;;  %s52_s18 = sadd.s32 1, %s1312_s29 }
  0xa6   : > { %p59_p7 = scmp.ne.s32.totalorder %s1312_s29, %s1308_s28  ;;  %p60_p9 = scmp.eq.s32.totalorder %s1324_s10, 0 }
  0xa7   : > { %s1789_s17 = smov (%p45_p8, %s43_s17), 0  ;;  %p65_p1 = scmp.ne.s32.totalorder %s1308_s28, %s1304_s27 }
  0xa8   : > { %p1568_p4 = por %p60_p9, %p59_p7  ;;  %s47_s11 = ssub.s32 %s1320_s9, %s1789_s17 }
  0xa9   : > { %s1771_s3 = sadd.s32 4294967295, %s1324_s10   ;;  %p50_p3 = scmp.eq.s32.totalorder %s47_s11, 0 }
  0xaa   : > { %p217_p6 = scmp.eq.s32.totalorder %s1771_s3, 1  ;;  %p1772_p10 = scmp.ne.s32.totalorder %s1764_s12, 0 }
  0xab   : > { %p223_p13 = scmp.eq.s32.totalorder %s803_s26, 1  ;;  %p928_p2 = scmp.lt.s32.totalorder %s1324_s10, 2 }
  0xac   : > { %p1580_p11 = por %p1772_p10, %p65_p1  ;;  %p1584_p12 = por %p217_p6, %p59_p7 }
  0xad   : > { %s1589_s23 = scalar_select %p50_p3, %s1312_s29, %s52_s18  }
  0xae   : > { %s1774_s8 = scalar_select %p1584_p12, 1, 0 }
  0xaf   : > { %p1591_p0 = por %p223_p13, %p65_p1  ;;  %s341_s14 = sand.u32 1, %s1312_s29  }
  0xb0   : > { %s813_s19 = sshll.u32 %s1320_s9, 7  ;;  %s812_s21 = sshll.u32 %s341_s14, 3 }
  0xb1   : > { %s1775_s1 = scalar_select %p1591_p0, 1, 0 }
  0xb2   : > { %s1601_s24 = scalar_lea.hbm %s1746_s0, %s813_s19  ;;  %s345_s25 = scalar_lea.vmem [#allocation2], %s812_s21 }
  0xb3   : > { %s353_s26 = sshll.u32 %s345_s25, 4  ;;  %p1605_p5 = pnand %p928_p2, %p1568_p4  ;;  %s1609_s26 = int_to_ptr.vmem [resolvable:$true] %s353_s26 }
  0xb4   : > { %s342_s11 = scalar_lea.sflag [#allocation3], %s341_s14  ;;  %s1168_s3 = scalar_lea.hbm %s1601_s24, 128 }
  0xb5   : > { %p1169_p8 = scmp.ne.s32.totalorder %s1601_s24, %s1168_s3  ;;  %p1170_p7 = pneg %p1605_p5 }
  0xb6   : > { %s1173_s20 = scalar_lea.hbm %s1746_s0, 256  ;;  %p1174_p4 = scmp.lt.u32.totalorder %s1601_s24, %s1746_s0 }
  0xb7   : > { %p1171_p9 = pnand %p1170_p7, %p1169_p8  ;;  %p1175_p6 = scmp.lt.u32.totalorder %s1173_s20, %s1168_s3 }
  0xb8   : > { %p1177_p10 = scmp.lt.u32.totalorder %s1168_s3, %s1601_s24 }
  0xb9   : > { %p1172_p1 = pneg %p1171_p9  ;;  %p1176_p3 = por %p1175_p6, %p1174_p4 }
  0xbb   : > { %p1178_p13 = por %p1177_p10, %p1176_p3 }
  0xbd   : > { %p1179_p2 = pnand %p1178_p13, %p1172_p1 }
  0xbf   : > { %1182 = shalt.err (!%p1179_p2)
}
  0xc0   : > { %s1183_s14 = scalar_lea.vmem %s1609_s26, 128  ;;  %s1334_s25 = smov [#allocation2]  }
  0xc1   : > { %p1184_p8 = scmp.ne.s32.totalorder %s1609_s26, %s1183_s14  ;;  %s1188_s19 = sshll.u32 %s1334_s25, 4  ;;  %s1189_s19 = int_to_ptr.vmem [resolvable:$false] %s1188_s19 }
  0xc2   : > { %s1190_s21 = scalar_lea.vmem %s1189_s19, 256  ;;  %p1191_p12 = scmp.lt.s32.totalorder %s1609_s26, %s1189_s19 }
  0xc3   : > { %p1186_p9 = pnand %p1184_p8, %p1170_p7  ;;  %p1192_p4 = scmp.lt.s32.totalorder %s1190_s21, %s1183_s14 }
  0xc5   : > { %p1187_p0 = pneg %p1186_p9  ;;  %p1193_p6 = por %p1192_p4, %p1191_p12 }
  0xc7   : > { %p1194_p3 = pnand %p1193_p6, %p1187_p0 }
  0xc9   : > { %1197 = shalt.err (!%p1194_p3)
}
  0xca   : > { %914 = dma.hbm_to_vmem [thread:$0]  (!%p1605_p5), %s1601_s24, 128, %s1609_s26, %s342_s11  }
  0xcb   : > { %p1777_p1 = scmp.ne.s32.totalorder %s1765_s13, 0 }
  0xcc   : > { %s1639_s3 = sand.u32 (!%p1777_p1), 1, %s1308_s28  }
  0xcd   : > { %362 = sbr.rel (%p1777_p1) target bundleno = 789 (0x315), region = 48  ;;  %s815_s20 = sshll.u32 (!%p1777_p1), %s1639_s3, 3 }
  0xce   : > { %s365_s16 = scalar_lea.sflag (!%p1777_p1), [#allocation3], %s1639_s3  ;;  %s368_s15 = scalar_lea.vmem (!%p1777_p1), [#allocation2], %s815_s20 }
  0xd4   : > { %1279 = dma.done.wait (%p1580_p11), %s365_s16, 128  }
  0xd5   : > { %1281 = vsyncadd (%p1580_p11), %s365_s16, 4294967168  ;;  %p1778_p12 = scmp.ne.s32.totalorder %s1764_s12, 0 }
  0xd7   : > { %1283 = dma.done.wait (%p1778_p12), [#allocation6], 32  }
  0xd8   : > { %1285 = vsyncadd (%p1778_p12), [#allocation6], 4294967264 }
  0xd9   : > { %1287 = dma.done.wait (%p1778_p12), [#allocation9], 272  }
  0xda   : > { %1289 = vsyncadd (%p1778_p12), [#allocation9], 4294967024 }
  0xdb   : > { %1291 = dma.done.wait (%p1778_p12), [#allocation12], 272  }
  0xdc   : > { %1293 = vsyncadd (%p1778_p12), [#allocation12], 4294967024  ;;  %vm434_vm0 = vcmask 261120   ;;  %v431_v0 = vld [vmem:[%s368_s15] sm:$0xff]  ;;  %v994_v7 = vld [vmem:[#allocation8] sm:$0xff]   ;;  %v1335_v9 = vmov 0.0  }
  0xdd   : > { %v435_v1 = vsel %vm434_vm0, %v431_v0, 0.0  ;;  %v995_v8 = vld [vmem:[#allocation11] sm:$0xff]   ;;  %846 = vmatprep.subr.bf16.mxu0 %v1335_v9  ;;  %854 = vmatprep.subr.bf16.mxu1 %v1335_v9  ;;  %v996_v10 = vld [vmem:[#allocation8 + $0x8] sm:$0xff]   ;;  %v997_v11 = vld [vmem:[#allocation11 + $0x8] sm:$0xff]   ;;  %vm1336_vm1 = vmmov 0   ;;  %s822_s12 = sshll.u32 %s1639_s3, 2 }
  0xde   : > { %436 = vadd.xlane.f32.xlu0 %v435_v1  ;;  %847 = vmatpush3.bf16.msra.mxu0 %v994_v7  ;;  %v824_v16 = vld [vmem:[#allocation5] ss:$0 sm:$0xff]  ;;  %v825_v18 = vld [vmem:[#allocation7] ss:$0 sm:$0xff]  ;;  %v826_v22 = vld [vmem:[#allocation10] ss:$0 sm:$0xff] }
  0xdf   : > { %855 = vmatpush3.bf16.msra.mxu1 %v995_v8  ;;  %848 = vmatprep.subr.bf16.mxu0 %v1335_v9  ;;  %v830_v23 = vld [vmem:[#allocation13] ss:$0 sm:$0xff]  ;;  %s836_s13 = sshll.u32 %s1316_s30, 6  ;;  %s422_s22 = scalar_lea.vmem [#allocation14], %s822_s12  ;;  %vm594_vm2 = vcmask 257024  }
  0xe0   : > { %856 = vmatprep.subr.bf16.mxu1 %v1335_v9  ;;  %850 = vmatprep.mubr.msk.bf16.mxu0 %vm1336_vm1, %v1335_v9  ;;  %s618_s24 = sshll.u32 %s422_s22, 4  ;;  %s429_s26 = scalar_lea.vmem [#allocation15], %s822_s12  ;;  %s1670_s24 = int_to_ptr.vmem [resolvable:$true] %s618_s24 }
  0xe1   : > { %858 = vmatprep.mubr.msk.bf16.mxu1 %vm1336_vm1, %v1335_v9  ;;  %s632_s18 = sshll.u32 %s429_s26, 4  ;;  %s1668_s25 = scalar_lea.hbm %s1753_s7, %s836_s13  ;;  %s1677_s18 = int_to_ptr.vmem [resolvable:$true] %s632_s18 }
  0xe2   : > { %849 = vmatpush3.bf16.msra.mxu0 %v996_v10  ;;  %s1779_s21 = sld [smem:[#allocation25_spill]]  ;;  %s599_s16 = scalar_lea.sflag [#allocation4], %s1639_s3 }
  0xe3   : > { %857 = vmatpush3.bf16.msra.mxu1 %v997_v11  ;;  %s1198_s15 = scalar_lea.vmem %s1670_s24, 64  ;;  %p1780_p0 = scmp.ne.s32.totalorder %s1774_s8, 0 }
  0xe4   : > { %p1199_p11 = scmp.ne.s32.totalorder %s1670_s24, %s1198_s15  ;;  %s1337_s12 = smov [#allocation14]  }
  0xe5   : > { %s1202_s11 = sshll.u32 %s1337_s12, 4  ;;  %s1203_s11 = int_to_ptr.vmem [resolvable:$false] %s1202_s11 }
  0xe6   : > { %p1200_p5 = pnand %p1199_p11, %p1780_p0  ;;  %s1204_s14 = scalar_lea.vmem %s1203_s11, 128 }
  0xe7   : > { %p1205_p10 = scmp.lt.s32.totalorder %s1670_s24, %s1203_s11  ;;  %p1206_p13 = scmp.lt.s32.totalorder %s1204_s14, %s1198_s15 }
  0xe8   : > { %s1675_s20 = scalar_lea.hbm %s1779_s21, %s836_s13  ;;  %p1201_p7 = pneg %p1200_p5 }
  0xe9   : > { %p1207_p2 = por %p1206_p13, %p1205_p10 }
  0xeb   : > { %p1208_p8 = pnand %p1207_p2, %p1201_p7 }
 0x16b   : > { %v437_v2 = vpop.xlane.xlu0 %436 }
 0x16c   : > { %v439_v3 = vmul.f32 0.03125, %v437_v2 }
 0x16e   : > { %v440_v4 = vsub.f32 %v431_v0, %v439_v3 }
 0x170   : > { %v441_v5 = vmul.f32 %v440_v4, %v440_v4 }
 0x172   : > { %v442_v6 = vsel %vm434_vm0, %v441_v5, 0.0 }
 0x173   : > { %443 = vadd.xlane.f32.xlu0 %v442_v6 }
 0x200   : > { %v444_v12 = vpop.xlane.xlu0 %443 }
 0x201   : > { %v445_v13 = vmul.f32 0.03125, %v444_v12 }
 0x203   : > { %v446_v14 = vadd.f32 1e-05, %v445_v13 }
 0x205   : > { %998 = vrsqrt.f32 %v446_v14 }
 0x20f   : > { %v999_v15 = vpop.eup %998 }
 0x210   : > { %v448_v17 = vmul.f32 %v999_v15, %v440_v4 }
 0x212   : > { %v455_v19 = vmul.f32 %v824_v16, %v448_v17 }
 0x214   : > { %v462_v20 = vadd.f32 %v825_v18, %v455_v19 }
 0x216   : > { %v463_v21 = vpack.c.bf16 %v462_v20, %v462_v20 }
 0x218   : > { %851 = vmatmul.mubr.msk.bf16.vlgmr.msra.gmra.mrb[0].mxu0 %vm434_vm0, %v463_v21  ;;  %859 = vmatmul.mubr.msk.bf16.vlgmr.msra.gmra.mrb[0].mxu1 %vm434_vm0, %v463_v21 }
 0x2eb   : > { %v524_v24 = vpop.f32.mrb[0].mxu0  ;;  %v587_v25 = vpop.f32.mrb[0].mxu1 }
 0x2ec   : > { %v525_v26 = vadd.f32 %v826_v22, %v524_v24  ;;  %v588_v27 = vadd.f32 %v830_v23, %v587_v25  ;;  %v852_v28 = vpop.f32.mrb[1].mxu0  ;;  %v860_v29 = vpop.f32.mrb[1].mxu1 }
 0x2ed   : > { %v527_v30 = vpop.f32.mrb[2].mxu0  ;;  %v590_v31 = vpop.f32.mrb[2].mxu1 }
 0x2ee   : > { %v593_v32 = vpack.c.bf16 %v525_v26, %v525_v26  ;;  %v596_v33 = vpack.c.bf16 %v588_v27, %v588_v27  ;;  %v853_v34 = vpop.f32.mrb[3].mxu0  ;;  %v861_v35 = vpop.f32.mrb[3].mxu1 }
 0x2f0   : > { %595 = vst.msk [vmem:[%s422_s22] sm:$0xf] %vm594_vm2, %v593_v32  ;;  %597 = vst.msk [vmem:[%s429_s26] sm:$0xf] %vm594_vm2, %v596_v33 }
 0x2f1   : > { %1211 = shalt.err (!%p1208_p8)
}
 0x2f2   : > { %s1212_s13 = scalar_lea.hbm %s1668_s25, 64  ;;  %s1216_s30 = scalar_lea.hbm %s1753_s7, 128 }
 0x2f3   : > { %p1213_p9 = scmp.ne.s32.totalorder %s1668_s25, %s1212_s13  ;;  %p1217_p3 = scmp.lt.u32.totalorder %s1668_s25, %s1753_s7 }
 0x2f4   : > { %p1218_p1 = scmp.lt.u32.totalorder %s1216_s30, %s1212_s13  ;;  %p1220_p11 = scmp.lt.u32.totalorder %s1212_s13, %s1668_s25 }
 0x2f5   : > { %p1214_p4 = pnand %p1213_p9, %p1780_p0 }
 0x2f6   : > { %p1219_p12 = por %p1218_p1, %p1217_p3 }
 0x2f7   : > { %p1215_p6 = pneg %p1214_p4 }
 0x2f8   : > { %p1221_p5 = por %p1220_p11, %p1219_p12 }
 0x2fa   : > { %p1222_p7 = pnand %p1221_p5, %p1215_p6 }
 0x2fc   : > { %1225 = shalt.err (!%p1222_p7)
}
 0x2fd   : > { %888 = dma.vmem_to_hbm [thread:$0]  (%p1780_p0), %s1670_s24, 64, %s1668_s25, %s599_s16  }
 0x2fe   : > { %s604_s15 = scalar_lea.sflag [#allocation16], %s1639_s3  ;;  %s1226_s11 = scalar_lea.vmem %s1677_s18, 64 }
 0x2ff   : > { %p1227_p10 = scmp.ne.s32.totalorder %s1677_s18, %s1226_s11  ;;  %s1338_s14 = smov [#allocation15]  }
 0x300   : > { %s1230_s13 = sshll.u32 %s1338_s14, 4  ;;  %s1231_s13 = int_to_ptr.vmem [resolvable:$false] %s1230_s13 }
 0x301   : > { %p1228_p13 = pnand %p1227_p10, %p1780_p0  ;;  %s1232_s22 = scalar_lea.vmem %s1231_s13, 128 }
 0x302   : > { %p1233_p8 = scmp.lt.s32.totalorder %s1677_s18, %s1231_s13  ;;  %p1234_p9 = scmp.lt.s32.totalorder %s1232_s22, %s1226_s11 }
 0x303   : > { %p1229_p2 = pneg %p1228_p13 }
 0x304   : > { %p1235_p4 = por %p1234_p9, %p1233_p8 }
 0x306   : > { %p1236_p6 = pnand %p1235_p4, %p1229_p2 }
 0x308   : > { %1239 = shalt.err (!%p1236_p6)
}
 0x309   : > { %s1240_s3 = scalar_lea.hbm %s1675_s20, 64  ;;  %s1244_s16 = scalar_lea.hbm %s1779_s21, 128 }
 0x30a   : > { %p1241_p3 = scmp.ne.s32.totalorder %s1675_s20, %s1240_s3  ;;  %p1245_p11 = scmp.lt.u32.totalorder %s1675_s20, %s1779_s21 }
 0x30b   : > { %p1246_p5 = scmp.lt.u32.totalorder %s1244_s16, %s1240_s3  ;;  %p1248_p10 = scmp.lt.u32.totalorder %s1240_s3, %s1675_s20 }
 0x30c   : > { %p1242_p1 = pnand %p1241_p3, %p1780_p0 }
 0x30d   : > { %p1247_p7 = por %p1246_p5, %p1245_p11 }
 0x30e   : > { %p1243_p12 = pneg %p1242_p1 }
 0x30f   : > { %p1249_p13 = por %p1248_p10, %p1247_p7 }
 0x311   : > { %p1250_p2 = pnand %p1249_p13, %p1243_p12 }
 0x313   : > { %1253 = shalt.err (!%p1250_p2)
}
 0x314   : > { %889 = dma.vmem_to_hbm [thread:$0]  (%p1780_p0), %s1677_s18, 64, %s1675_s20, %s604_s15  }
 0x315 PF: > { %s644_s19 = sand.u32 1, %s1304_s27   ;;  %p1781_p8 = scmp.ne.s32.totalorder %s1775_s1, 0 }
 0x316   : > { %p1782_p9 = scmp.ge.s32.totalorder %s1324_s10, 2  ;;  %s645_s12 = scalar_lea.sflag [#allocation4], %s644_s19 }
 0x318   : > { %p916_p4 = pnand %p1782_p9, %p1781_p8 }
 0x31a   : > { %1295 = dma.done.wait (!%p916_p4), %s645_s12, 64  }
 0x31b   : > { %1297 = vsyncadd (!%p916_p4), %s645_s12, 4294967232  ;;  %s654_s11 = scalar_lea.sflag [#allocation16], %s644_s19 }
 0x31c   : > { %1299 = dma.done.wait (!%p916_p4), %s654_s11, 64  }
 0x31d   : > { %1301 = vsyncadd (!%p916_p4), %s654_s11, 4294967232  ;;  %s31_s10 = sadd.s32 1, %s1324_s10   ;;  %s1783_s27 = smov %s1308_s28 }
 0x31e   : > { %p28_p6 = scmp.ge.s32.totalorder %s31_s10, 4   ;;  %s1784_s28 = smov %s1312_s29 }
 0x31f   : > { %s1785_s29 = smov %s1589_s23  ;;  %s1786_s30 = smov %s1320_s9 }
 0x320   : > { %s1787_s9 = smov %s1789_s17  ;;  %30 = sbr.rel (!%p28_p6) target bundleno = 15 (0xf), region = 134 }
 0x327   :  { %659 = vsyncpa [#allocation3], 1 }
 0x328   :  { %661 = vsyncpa [#allocation3 + $0x1], 1 }
 0x329   :  { %662 = vsyncpa [#allocation6], 1 }
 0x32a   :  { %663 = vsyncpa [#allocation9], 1 }
 0x32b   :  { %664 = vsyncpa [#allocation12], 1 }
 0x32c   :  { %665 = vsyncpa [#allocation4], 1 }
 0x32d   :  { %667 = vsyncpa [#allocation4 + $0x1], 1 }
 0x32e   :  { %668 = vsyncpa [#allocation16], 1 }
 0x32f   :  { %670 = vsyncpa [#allocation16 + $0x1], 1 }

</bundles_post_ra>
